<compile_context>
chip_gen: v5e
topology: v5e:2x2
jax: 0.10.0
libtpu: 0.0.40
codegen_flags: <defaults>
</compile_context>

<pallas_src>
import jax
import jax.numpy as jnp
import numpy as np
from jax import lax
from jax.experimental import pallas as pl
from jax.experimental.pallas import tpu as pltpu

# ---- Hyperparameters (mirror EEGNet.__init__ arithmetic, incl. Python round) ----
FS = 32
CHANNEL = 4
NUM_CLASS = 4
SIGNAL_LEN = 128
BATCH = 2

F1 = 8
D = 3
F2 = D * F1                               # 24
K1 = int(round(FS / 2))                   # 16
K3 = int(round(FS / 8))                   # 4
PAD1 = int(round((K1 - 1) / 2)) - 1       # 7   (kernel_padding_1[1])
PAD3 = int(round((K3 - 1) / 2))           # 2   (kernel_padding_3[1])
POOL1 = 4
POOL2 = 8

W1 = SIGNAL_LEN + 2 * PAD1 - K1 + 1       # 127 valid outputs of the first temporal conv
W1P = 128                                 # lane-dense padded width
W2 = W1 // POOL1                          # 31  after avgpool (1,4)
ZPW = W2 + 2 * PAD3                       # 35  pooled + zero-pad for separable conv
W3 = ZPW - K3 + 1                         # 32  after separable depthwise conv
W4 = W3 // POOL2                          # 4   after avgpool (1,8)
FLAT = F2 * W4                            # 96
assert FLAT == F2 * int(round(SIGNAL_LEN / 32)), "Dense in_features mismatch"
BN_EPS = 1e-5

# ---- Chunking: fixed per-grid-step batch chunk (BC=4 -> 256-wide contraction,
#      MXU-native on v6e/v7x; use 2 on v5e). Weight packs are O(BC^2), not O(B^2).
BC = 4
ROWS = BC * F2                            # 96  rows per chunk (= chunk_batch * F2)
BCK = BC * CHANNEL * K1                   # 256 step-1 contraction dim

# 128-lane-aligned segment offsets inside the parameter packs
V_BIAS1, V_TAPS, V_BIASP, V_FC = 0, 128, 256, 384        # vpack  (ROWS, 512) f32
P_POOL1, P_POOL2, P_SEL, P_FCB = 0, 128, 256, 384        # ppack  (128,  512) f32


# ---------------------------------------------------------------------------
# Pallas kernel: one chunk of BC samples per grid step.
# ---------------------------------------------------------------------------
def eegnet_kernel(xcol_ref, w1_ref, wp_ref, v_ref, p_ref, out_ref):
    def elu(t):
        # clamp exp arg so the (discarded) positive branch never overflows
        return jnp.where(t > 0, t, jnp.exp(jnp.minimum(t, 0.0)) - 1.0)

    x = xcol_ref[0]                                                   # (BCK, 128) bf16

    # (1) temporal conv + BN1 + EEG-channel depthwise conv + BN2 (folded
    #     host-side into one block-diagonal weight) + ELU: one bf16 MXU matmul.
    z = jnp.dot(w1_ref[...], x, preferred_element_type=jnp.float32)   # (ROWS, 128)
    z = elu(z + v_ref[:, V_BIAS1:V_BIAS1 + 1])

    # (2)+(3) AvgPool2d(1,4), PAD3 zero-pad and the K3 temporal shifts of the
    #     separable depthwise conv as ONE lane-dense (128,128) pool matrix,
    #     then K3 tap MACs on 32-lane-aligned blocks of its result.
    zp = jnp.dot(z, p_ref[:, P_POOL1:P_POOL1 + K3 * W3],
                 preferred_element_type=jnp.float32)                  # (ROWS, 128)
    taps = v_ref[:, V_TAPS:V_TAPS + K3]
    s = taps[:, 0:1] * zp[:, 0:W3]
    for k in range(1, K3):
        s = s + taps[:, k:k + 1] * zp[:, k * W3:(k + 1) * W3]         # (ROWS, W3)

    # (4) separable pointwise 1x1 conv + BN3 (+ folded depthwise bias) + ELU.
    p = jnp.dot(wp_ref[...], s, preferred_element_type=jnp.float32)
    p = elu(p + v_ref[:, V_BIASP:V_BIASP + 1])                        # (ROWS, W3)

    # (5) AvgPool2d(1,8) as a matmul.
    q = jnp.dot(p, p_ref[0:W3, P_POOL2:P_POOL2 + W4],
                preferred_element_type=jnp.float32)                   # (ROWS, W4)

    # (6) Flatten + Dense: W4 tap MACs per row, then a tiny batch-block
    #     selector matmul; softmax via EUP reciprocal.
    fc = v_ref[:, V_FC:V_FC + W4 * NUM_CLASS]
    t1 = q[:, 0:1] * fc[:, 0:NUM_CLASS]
    for v in range(1, W4):
        t1 = t1 + q[:, v:v + 1] * fc[:, v * NUM_CLASS:(v + 1) * NUM_CLASS]
    logits = jnp.dot(p_ref[0:BC, P_SEL:P_SEL + ROWS], t1,
                     preferred_element_type=jnp.float32)
    logits = logits + p_ref[0:1, P_FCB:P_FCB + NUM_CLASS]             # (BC, NUM_CLASS)

    m = jnp.max(logits, axis=1, keepdims=True)
    e = jnp.exp(logits - m)
    out_ref[0] = e * pl.reciprocal(jnp.sum(e, axis=1, keepdims=True),
                                   approx=True)


# ---------------------------------------------------------------------------
# Wrapper: pad batch to chunks of BC, im2col (bf16), batch grid pallas_call.
# ---------------------------------------------------------------------------
@jax.jit
def eegnet_forward(x, w1pack, wppack, vpack, ppack):
    """x: (B, 1, CHANNEL, SIGNAL_LEN) float32 -> (B, NUM_CLASS) softmax probs."""
    b = x.shape[0]
    g = -(-b // BC)                                              # cdiv(B, BC)
    bpad = g * BC
    xs = x[:, 0, :, :].astype(jnp.float32)                       # (B, C, L)
    xs = jnp.pad(xs, ((0, bpad - b), (0, 0), (0, 0)))            # pad batch to chunks
    rpad = (W1P + K1 - 1) - SIGNAL_LEN - PAD1                    # pad time to 143
    xp = jnp.pad(xs, ((0, 0), (0, 0), (PAD1, rpad)))
    # TODO(synk): generate the im2col in-kernel from the raw padded signal to
    # cut the activation DMA a further ~16x; wrapper-side for now.
    # im2col rows: (local_b*C + c)*K1 + k ; cols: output time (128, lane-dense).
    cols = jnp.stack([xp[:, :, k:k + W1P] for k in range(K1)], axis=2)
    xcol = cols.reshape(g, BCK, W1P).astype(jnp.bfloat16)        # (G, 256, 128)

    out = pl.pallas_call(
        eegnet_kernel,
        out_shape=jax.ShapeDtypeStruct((g, BC, NUM_CLASS), jnp.float32),
        grid_spec=pltpu.PrefetchScalarGridSpec(
            num_scalar_prefetch=0,
            grid=(g,),
            in_specs=[
                pl.BlockSpec((1, BCK, W1P), lambda i: (i, 0, 0)),   # per-chunk im2col
                pl.BlockSpec((ROWS, BCK), lambda i: (0, 0)),        # fused conv1 weight
                pl.BlockSpec((ROWS, ROWS), lambda i: (0, 0)),       # pointwise weight
                pl.BlockSpec((ROWS, 4 * 128), lambda i: (0, 0)),    # per-row vectors
                pl.BlockSpec((W1P, 4 * 128), lambda i: (0, 0)),     # pool/sel/bias
            ],
            out_specs=pl.BlockSpec((1, BC, NUM_CLASS), lambda i: (i, 0, 0)),
        ),
        compiler_params=pltpu.CompilerParams(
            dimension_semantics=("parallel",)),
    )(xcol, w1pack, wppack, vpack, ppack)
    return out.reshape(bpad, NUM_CLASS)[:b]


# ---------------------------------------------------------------------------
# Raw parameters with the exact PyTorch module shapes (eval-mode BN stats)
# ---------------------------------------------------------------------------
def init_raw_params(key):
    ks = jax.random.split(key, 22)

    def rnd(k, shape, scale=0.1):
        return (scale * jax.random.normal(k, shape)).astype(jnp.float32)

    w1 = rnd(ks[0], (F1, 1, 1, K1));      b1 = rnd(ks[1], (F1,))
    g1 = 1.0 + rnd(ks[2], (F1,));         be1 = rnd(ks[3], (F1,))
    rm1 = rnd(ks[4], (F1,));              rv1 = 1.0 + 0.1 * jnp.abs(jax.random.normal(ks[5], (F1,)))

    wd = rnd(ks[6], (F2, 1, CHANNEL, 1)); bd = rnd(ks[7], (F2,))
    g2 = 1.0 + rnd(ks[8], (F2,));         be2 = rnd(ks[9], (F2,))
    rm2 = rnd(ks[10], (F2,));             rv2 = 1.0 + 0.1 * jnp.abs(jax.random.normal(ks[11], (F2,)))

    wsd = rnd(ks[12], (F2, 1, 1, K3));    bsd = rnd(ks[13], (F2,))
    wpt = rnd(ks[14], (F2, F2, 1, 1));    bpt = rnd(ks[15], (F2,))
    g3 = 1.0 + rnd(ks[16], (F2,));        be3 = rnd(ks[17], (F2,))
    rm3 = rnd(ks[18], (F2,));             rv3 = 1.0 + 0.1 * jnp.abs(jax.random.normal(ks[19], (F2,)))

    wfc = rnd(ks[20], (NUM_CLASS, FLAT)); bfc = rnd(ks[21], (NUM_CLASS,))

    return (w1, b1, g1, be1, rm1, rv1,
            wd, bd, g2, be2, rm2, rv2,
            wsd, bsd, wpt, bpt, g3, be3, rm3, rv3,
            wfc, bfc)


def _fold_bn(gamma, beta, mean, var):
    a = gamma / jnp.sqrt(var + BN_EPS)
    return a.astype(jnp.float32), (beta - mean * a).astype(jnp.float32)


def pack_params(raw):
    """Fold BN into conv weights, fuse conv1 with the EEG-channel depthwise
    conv, pack everything for a fixed chunk of BC samples with every segment
    128-lane aligned. Pack sizes are constant in the total batch size."""
    (w1, b1, g1, be1, rm1, rv1,
     wd, bd, g2, be2, rm2, rv2,
     wsd, bsd, wpt, bpt, g3, be3, rm3, rv3,
     wfc, bfc) = raw

    a1, c1 = _fold_bn(g1, be1, rm1, rv1)
    a2, c2 = _fold_bn(g2, be2, rm2, rv2)
    a3, c3 = _fold_bn(g3, be3, rm3, rv3)

    w1m = w1.reshape(F1, K1)
    wdm = wd.reshape(F2, CHANNEL)
    grp = jnp.arange(F2) // D                                    # out-channel -> group

    # conv1 (+BN1) fused with the EEG-channel depthwise conv (+BN2).
    w1f = a1[:, None] * w1m
    b1f = a1 * b1 + c1
    wcomb = a2[:, None, None] * wdm[:, :, None] * w1f[grp][:, None, :]   # (F2, C, K1)
    bcomb = a2 * (jnp.sum(wdm, axis=1) * b1f[grp] + bd) + c2             # (F2,)
    eye = jnp.eye(BC, dtype=jnp.float32)
    w1big = jnp.kron(eye, wcomb.reshape(F2, CHANNEL * K1))               # (ROWS, BCK)

    # separable pointwise 1x1 + BN3, with the depthwise-sep bias folded in.
    wpf = a3[:, None] * wpt.reshape(F2, F2)
    bpf = wpf @ bsd + a3 * bpt + c3
    wpbig = jnp.kron(eye, wpf)                                           # (ROWS, ROWS)

    # dense taps: fc[local_b*F2+o, v*NUM_CLASS+n] = wfc[n, o*W4 + v]
    wfc_r = wfc.reshape(NUM_CLASS, F2, W4).transpose(1, 2, 0).reshape(F2, W4 * NUM_CLASS)

    # vpack: per-row vectors, every segment at a 128-lane boundary.
    vpack = jnp.zeros((ROWS, 4 * 128), jnp.float32)
    vpack = vpack.at[:, V_BIAS1].set(jnp.tile(bcomb, (BC,)))
    vpack = vpack.at[:, V_TAPS:V_TAPS + K3].set(jnp.tile(wsd.reshape(F2, K3), (BC, 1)))
    vpack = vpack.at[:, V_BIASP].set(jnp.tile(bpf, (BC,)))
    vpack = vpack.at[:, V_FC:V_FC + W4 * NUM_CLASS].set(jnp.tile(wfc_r, (BC, 1)))

    # ppack: pooling matrices, batch-block selector, dense bias (fixed structure).
    p1full = np.zeros((W1P, ZPW), np.float32)    # avgpool(1,4) + PAD3 zero padding
    for v in range(W2):                          # floor pooling: drops last 3 samples
        p1full[POOL1 * v:POOL1 * (v + 1), PAD3 + v] = 1.0 / POOL1
    pcat = np.zeros((W1P, K3 * W3), np.float32)  # + K3 temporal shifts, concatenated
    for k in range(K3):
        pcat[:, k * W3:(k + 1) * W3] = p1full[:, k:k + W3]
    p2 = np.zeros((W3, W4), np.float32)          # avgpool(1,8)
    for v in range(W4):
        p2[POOL2 * v:POOL2 * (v + 1), v] = 1.0 / POOL2
    sel = np.zeros((BC, ROWS), np.float32)       # sum each F2-row block -> one sample
    for i in range(BC):
        sel[i, i * F2:(i + 1) * F2] = 1.0

    ppack = np.zeros((W1P, 4 * 128), np.float32)
    ppack[:, P_POOL1:P_POOL1 + K3 * W3] = pcat
    ppack[:W3, P_POOL2:P_POOL2 + W4] = p2
    ppack[:BC, P_SEL:P_SEL + ROWS] = sel
    ppack = jnp.asarray(ppack).at[0, P_FCB:P_FCB + NUM_CLASS].set(bfc)

    return (w1big.astype(jnp.bfloat16),          # bf16 MXU weight (big matmul)
            wpbig.astype(jnp.float32),           # tiny matmuls stay f32
            vpack, ppack)


# ---------------------------------------------------------------------------
# Pure-JAX layer-by-layer reference (PyTorch eval-mode semantics)
# ---------------------------------------------------------------------------
def _bn_eval(y, g, b, m, v):
    scale = (g / jnp.sqrt(v + BN_EPS))[None, :, None, None]
    return (y - m[None, :, None, None]) * scale + b[None, :, None, None]


def _elu(v):
    return jnp.where(v > 0, v, jnp.exp(jnp.minimum(v, 0.0)) - 1.0)


def _avg_pool_w(y, k):
    s = lax.reduce_window(y, 0.0, lax.add, (1, 1, 1, k), (1, 1, 1, k), "VALID")
    return s / k


def ref_forward(x, raw):
    (w1, b1, g1, be1, rm1, rv1,
     wd, bd, g2, be2, rm2, rv2,
     wsd, bsd, wpt, bpt, g3, be3, rm3, rv3,
     wfc, bfc) = raw
    dn = ("NCHW", "OIHW", "NCHW")
    hp = lax.Precision.HIGHEST
    y = lax.conv_general_dilated(x.astype(jnp.float32), w1, (1, 1),
                                 ((0, 0), (PAD1, PAD1)), dimension_numbers=dn,
                                 precision=hp) + b1[None, :, None, None]
    y = _bn_eval(y, g1, be1, rm1, rv1)
    y = lax.conv_general_dilated(y, wd, (1, 1), ((0, 0), (0, 0)),
                                 dimension_numbers=dn, feature_group_count=F1,
                                 precision=hp) + bd[None, :, None, None]
    y = _elu(_bn_eval(y, g2, be2, rm2, rv2))
    y = _avg_pool_w(y, POOL1)                    # Dropout2d: identity in eval
    y = lax.conv_general_dilated(y, wsd, (1, 1), ((0, 0), (PAD3, PAD3)),
                                 dimension_numbers=dn, feature_group_count=F2,
                                 precision=hp) + bsd[None, :, None, None]
    y = lax.conv_general_dilated(y, wpt, (1, 1), ((0, 0), (0, 0)),
                                 dimension_numbers=dn,
                                 precision=hp) + bpt[None, :, None, None]
    y = _elu(_bn_eval(y, g3, be3, rm3, rv3))
    y = _avg_pool_w(y, POOL2)                    # Dropout2d: identity in eval
    y = y.reshape(y.shape[0], -1)                # Flatten (NCHW order)
    logits = jnp.dot(y, wfc.T, precision=hp) + bfc[None, :]
    return jax.nn.softmax(logits, axis=1)


if __name__ == "__main__":
    key = jax.random.PRNGKey(0)
    kx, kp = jax.random.split(key)
    x = jax.random.normal(kx, (BATCH, 1, CHANNEL, SIGNAL_LEN), jnp.float32)
    raw = init_raw_params(kp)
    w1pack, wppack, vpack, ppack = pack_params(raw)

    out = jax.block_until_ready(eegnet_forward(x, w1pack, wppack, vpack, ppack))
    assert out.shape == (BATCH, NUM_CLASS)

    ref = ref_forward(x, raw)
    # bf16 matmul inputs + approximate reciprocal in the softmax -> ~1e-2 tolerance.
    np.testing.assert_allclose(np.asarray(out), np.asarray(ref), atol=1e-2, rtol=1e-2)
    np.testing.assert_allclose(np.asarray(out).sum(axis=1), np.ones(BATCH), atol=5e-3)

    print("KERNEL_OK")
</pallas_src>

<mosaic_0001>
module attributes {stable_mosaic.version = 11 : i64} {
  func.func @eegnet_kernel(%arg0: i32, %arg1: memref<1x256x128xbf16, #tpu.memory_space<vmem>>, %arg2: memref<96x256xbf16, #tpu.memory_space<vmem>>, %arg3: memref<96x96xf32, #tpu.memory_space<vmem>>, %arg4: memref<96x512xf32, #tpu.memory_space<vmem>>, %arg5: memref<128x512xf32, #tpu.memory_space<vmem>>, %arg6: memref<1x4x4xf32, #tpu.memory_space<vmem>>) attributes {dimension_semantics = [#tpu.dimension_semantics<parallel>], iteration_bounds = array<i64: 1>, scalar_prefetch = 0 : i64, scratch_operands = 0 : i64, tpu.core_type = #tpu.core_type<tc>, window_params = [{transform_indices = @transform_0, window_bounds = array<i64: 1, 256, 128>}, {pipeline_mode = #tpu.pipeline_mode<synchronous>, transform_indices = @transform_1, window_bounds = array<i64: 96, 256>}, {pipeline_mode = #tpu.pipeline_mode<synchronous>, transform_indices = @transform_2, window_bounds = array<i64: 96, 96>}, {pipeline_mode = #tpu.pipeline_mode<synchronous>, transform_indices = @transform_3, window_bounds = array<i64: 96, 512>}, {pipeline_mode = #tpu.pipeline_mode<synchronous>, transform_indices = @transform_4, window_bounds = array<i64: 128, 512>}, {transform_indices = @transform_5, window_bounds = array<i64: 1, 4, 4>}]} {
    %c0 = arith.constant 0 : index
    %c0_0 = arith.constant 0 : index
    %c0_1 = arith.constant 0 : index
    %0 = vector.load %arg1[%c0, %c0_0, %c0_1] : memref<1x256x128xbf16, #tpu.memory_space<vmem>>, vector<1x256x128xbf16>
    %1 = vector.shape_cast %0 : vector<1x256x128xbf16> to vector<256x128xbf16>
    %c0_2 = arith.constant 0 : index
    %c0_3 = arith.constant 0 : index
    %2 = vector.load %arg2[%c0_2, %c0_3] : memref<96x256xbf16, #tpu.memory_space<vmem>>, vector<96x256xbf16>
    %cst = arith.constant dense<0.000000e+00> : vector<96x128xf32>
    %3 = tpu.matmul %2, %1, %cst {dimension_numbers = #tpu.dot_dimension_numbers<[1], [0], [0], [1], [0, 0, 1, 1], [], []>} : vector<96x256xbf16>, vector<256x128xbf16>, vector<96x128xf32> -> vector<96x128xf32>
    %c0_4 = arith.constant 0 : index
    %c0_5 = arith.constant 0 : index
    %4 = vector.load %arg4[%c0_4, %c0_5] : memref<96x512xf32, #tpu.memory_space<vmem>>, vector<96x1xf32>
    %5 = vector.broadcast %4 : vector<96x1xf32> to vector<96x128xf32>
    %6 = arith.addf %3, %5 : vector<96x128xf32>
    %cst_6 = arith.constant 0.000000e+00 : f32
    %7 = vector.broadcast %cst_6 : f32 to vector<96x128xf32>
    %8 = arith.cmpf ogt, %6, %7 : vector<96x128xf32>
    %cst_7 = arith.constant 0.000000e+00 : f32
    %9 = vector.broadcast %cst_7 : f32 to vector<96x128xf32>
    %10 = arith.minimumf %6, %9 : vector<96x128xf32>
    %11 = math.exp %10 : vector<96x128xf32>
    %cst_8 = arith.constant 1.000000e+00 : f32
    %12 = vector.broadcast %cst_8 : f32 to vector<96x128xf32>
    %13 = arith.subf %11, %12 : vector<96x128xf32>
    %14 = arith.select %8, %6, %13 : vector<96x128xi1>, vector<96x128xf32>
    %c0_9 = arith.constant 0 : index
    %c0_10 = arith.constant 0 : index
    %15 = vector.load %arg5[%c0_9, %c0_10] : memref<128x512xf32, #tpu.memory_space<vmem>>, vector<128x128xf32>
    %cst_11 = arith.constant dense<0.000000e+00> : vector<96x128xf32>
    %16 = tpu.matmul %14, %15, %cst_11 {dimension_numbers = #tpu.dot_dimension_numbers<[1], [0], [0], [1], [0, 0, 1, 1], [], []>} : vector<96x128xf32>, vector<128x128xf32>, vector<96x128xf32> -> vector<96x128xf32>
    %c0_12 = arith.constant 0 : index
    %c128 = arith.constant 128 : index
    %17 = vector.load %arg4[%c0_12, %c128] : memref<96x512xf32, #tpu.memory_space<vmem>>, vector<96x4xf32>
    %18 = vector.extract_strided_slice %17 {offsets = [0, 0], sizes = [96, 1], strides = [1, 1]} : vector<96x4xf32> to vector<96x1xf32>
    %19 = vector.extract_strided_slice %16 {offsets = [0, 0], sizes = [96, 32], strides = [1, 1]} : vector<96x128xf32> to vector<96x32xf32>
    %20 = vector.broadcast %18 : vector<96x1xf32> to vector<96x32xf32>
    %21 = arith.mulf %20, %19 : vector<96x32xf32>
    %22 = vector.extract_strided_slice %17 {offsets = [0, 1], sizes = [96, 1], strides = [1, 1]} : vector<96x4xf32> to vector<96x1xf32>
    %23 = vector.extract_strided_slice %16 {offsets = [0, 32], sizes = [96, 32], strides = [1, 1]} : vector<96x128xf32> to vector<96x32xf32>
    %24 = vector.broadcast %22 : vector<96x1xf32> to vector<96x32xf32>
    %25 = arith.mulf %24, %23 : vector<96x32xf32>
    %26 = arith.addf %21, %25 : vector<96x32xf32>
    %27 = vector.extract_strided_slice %17 {offsets = [0, 2], sizes = [96, 1], strides = [1, 1]} : vector<96x4xf32> to vector<96x1xf32>
    %28 = vector.extract_strided_slice %16 {offsets = [0, 64], sizes = [96, 32], strides = [1, 1]} : vector<96x128xf32> to vector<96x32xf32>
    %29 = vector.broadcast %27 : vector<96x1xf32> to vector<96x32xf32>
    %30 = arith.mulf %29, %28 : vector<96x32xf32>
    %31 = arith.addf %26, %30 : vector<96x32xf32>
    %32 = vector.extract_strided_slice %17 {offsets = [0, 3], sizes = [96, 1], strides = [1, 1]} : vector<96x4xf32> to vector<96x1xf32>
    %33 = vector.extract_strided_slice %16 {offsets = [0, 96], sizes = [96, 32], strides = [1, 1]} : vector<96x128xf32> to vector<96x32xf32>
    %34 = vector.broadcast %32 : vector<96x1xf32> to vector<96x32xf32>
    %35 = arith.mulf %34, %33 : vector<96x32xf32>
    %36 = arith.addf %31, %35 : vector<96x32xf32>
    %c0_13 = arith.constant 0 : index
    %c0_14 = arith.constant 0 : index
    %37 = vector.load %arg3[%c0_13, %c0_14] : memref<96x96xf32, #tpu.memory_space<vmem>>, vector<96x96xf32>
    %cst_15 = arith.constant dense<0.000000e+00> : vector<96x32xf32>
    %38 = tpu.matmul %37, %36, %cst_15 {dimension_numbers = #tpu.dot_dimension_numbers<[1], [0], [0], [1], [0, 0, 1, 1], [], []>} : vector<96x96xf32>, vector<96x32xf32>, vector<96x32xf32> -> vector<96x32xf32>
    %c0_16 = arith.constant 0 : index
    %c256 = arith.constant 256 : index
    %39 = vector.load %arg4[%c0_16, %c256] : memref<96x512xf32, #tpu.memory_space<vmem>>, vector<96x1xf32>
    %40 = vector.broadcast %39 : vector<96x1xf32> to vector<96x32xf32>
    %41 = arith.addf %38, %40 : vector<96x32xf32>
    %cst_17 = arith.constant 0.000000e+00 : f32
    %42 = vector.broadcast %cst_17 : f32 to vector<96x32xf32>
    %43 = arith.cmpf ogt, %41, %42 : vector<96x32xf32>
    %cst_18 = arith.constant 0.000000e+00 : f32
    %44 = vector.broadcast %cst_18 : f32 to vector<96x32xf32>
    %45 = arith.minimumf %41, %44 : vector<96x32xf32>
    %46 = math.exp %45 : vector<96x32xf32>
    %cst_19 = arith.constant 1.000000e+00 : f32
    %47 = vector.broadcast %cst_19 : f32 to vector<96x32xf32>
    %48 = arith.subf %46, %47 : vector<96x32xf32>
    %49 = arith.select %43, %41, %48 : vector<96x32xi1>, vector<96x32xf32>
    %c0_20 = arith.constant 0 : index
    %c128_21 = arith.constant 128 : index
    %50 = vector.load %arg5[%c0_20, %c128_21] : memref<128x512xf32, #tpu.memory_space<vmem>>, vector<32x4xf32>
    %cst_22 = arith.constant dense<0.000000e+00> : vector<96x4xf32>
    %51 = tpu.matmul %49, %50, %cst_22 {dimension_numbers = #tpu.dot_dimension_numbers<[1], [0], [0], [1], [0, 0, 1, 1], [], []>} : vector<96x32xf32>, vector<32x4xf32>, vector<96x4xf32> -> vector<96x4xf32>
    %c0_23 = arith.constant 0 : index
    %c384 = arith.constant 384 : index
    %52 = vector.load %arg4[%c0_23, %c384] : memref<96x512xf32, #tpu.memory_space<vmem>>, vector<96x16xf32>
    %53 = vector.extract_strided_slice %51 {offsets = [0, 0], sizes = [96, 1], strides = [1, 1]} : vector<96x4xf32> to vector<96x1xf32>
    %54 = vector.extract_strided_slice %52 {offsets = [0, 0], sizes = [96, 4], strides = [1, 1]} : vector<96x16xf32> to vector<96x4xf32>
    %55 = vector.broadcast %53 : vector<96x1xf32> to vector<96x4xf32>
    %56 = arith.mulf %55, %54 : vector<96x4xf32>
    %57 = vector.extract_strided_slice %51 {offsets = [0, 1], sizes = [96, 1], strides = [1, 1]} : vector<96x4xf32> to vector<96x1xf32>
    %58 = vector.extract_strided_slice %52 {offsets = [0, 4], sizes = [96, 4], strides = [1, 1]} : vector<96x16xf32> to vector<96x4xf32>
    %59 = vector.broadcast %57 : vector<96x1xf32> to vector<96x4xf32>
    %60 = arith.mulf %59, %58 : vector<96x4xf32>
    %61 = arith.addf %56, %60 : vector<96x4xf32>
    %62 = vector.extract_strided_slice %51 {offsets = [0, 2], sizes = [96, 1], strides = [1, 1]} : vector<96x4xf32> to vector<96x1xf32>
    %63 = vector.extract_strided_slice %52 {offsets = [0, 8], sizes = [96, 4], strides = [1, 1]} : vector<96x16xf32> to vector<96x4xf32>
    %64 = vector.broadcast %62 : vector<96x1xf32> to vector<96x4xf32>
    %65 = arith.mulf %64, %63 : vector<96x4xf32>
    %66 = arith.addf %61, %65 : vector<96x4xf32>
    %67 = vector.extract_strided_slice %51 {offsets = [0, 3], sizes = [96, 1], strides = [1, 1]} : vector<96x4xf32> to vector<96x1xf32>
    %68 = vector.extract_strided_slice %52 {offsets = [0, 12], sizes = [96, 4], strides = [1, 1]} : vector<96x16xf32> to vector<96x4xf32>
    %69 = vector.broadcast %67 : vector<96x1xf32> to vector<96x4xf32>
    %70 = arith.mulf %69, %68 : vector<96x4xf32>
    %71 = arith.addf %66, %70 : vector<96x4xf32>
    %c0_24 = arith.constant 0 : index
    %c256_25 = arith.constant 256 : index
    %72 = vector.load %arg5[%c0_24, %c256_25] : memref<128x512xf32, #tpu.memory_space<vmem>>, vector<4x96xf32>
    %cst_26 = arith.constant dense<0.000000e+00> : vector<4x4xf32>
    %73 = tpu.matmul %72, %71, %cst_26 {dimension_numbers = #tpu.dot_dimension_numbers<[1], [0], [0], [1], [0, 0, 1, 1], [], []>} : vector<4x96xf32>, vector<96x4xf32>, vector<4x4xf32> -> vector<4x4xf32>
    %c0_27 = arith.constant 0 : index
    %c384_28 = arith.constant 384 : index
    %74 = vector.load %arg5[%c0_27, %c384_28] : memref<128x512xf32, #tpu.memory_space<vmem>>, vector<1x4xf32>
    %75 = vector.broadcast %74 : vector<1x4xf32> to vector<4x4xf32>
    %76 = arith.addf %73, %75 : vector<4x4xf32>
    %cst_29 = arith.constant dense<0xFF800000> : vector<4xf32>
    %77 = vector.multi_reduction <maximumf>, %76, %cst_29 [1] : vector<4x4xf32> to vector<4xf32>
    %78 = vector.shape_cast %77 : vector<4xf32> to vector<4x1xf32>
    %79 = vector.broadcast %78 : vector<4x1xf32> to vector<4x4xf32>
    %80 = arith.subf %76, %79 : vector<4x4xf32>
    %81 = math.exp %80 : vector<4x4xf32>
    %cst_30 = arith.constant dense<0.000000e+00> : vector<4xf32>
    %82 = vector.multi_reduction <add>, %81, %cst_30 [1] : vector<4x4xf32> to vector<4xf32>
    %83 = vector.shape_cast %82 : vector<4xf32> to vector<4x1xf32>
    %84 = tpu.reciprocal %83 {approx = true} : vector<4x1xf32> -> vector<4x1xf32>
    %85 = vector.broadcast %84 : vector<4x1xf32> to vector<4x4xf32>
    %86 = arith.mulf %81, %85 : vector<4x4xf32>
    %c0_31 = arith.constant 0 : index
    %c0_32 = arith.constant 0 : index
    %c0_33 = arith.constant 0 : index
    %87 = vector.load %arg6[%c0_31, %c0_32, %c0_33] : memref<1x4x4xf32, #tpu.memory_space<vmem>>, vector<1x4x4xf32>
    %88 = vector.shape_cast %87 : vector<1x4x4xf32> to vector<4x4xf32>
    %89 = vector.shape_cast %86 : vector<4x4xf32> to vector<1x4x4xf32>
    tpu.vector_store %arg6[%c0_31, %c0_32, %c0_33], %89 {strides = array<i32>} : memref<1x4x4xf32, #tpu.memory_space<vmem>>, vector<1x4x4xf32>,
    return
  }
  func.func @transform_0(%arg0: i32) -> (i32, i32, i32) {
    %c0_i32 = arith.constant 0 : i32
    %c0_i32_0 = arith.constant 0 : i32
    %c0_i32_1 = arith.constant 0 : i32
    return %arg0, %c0_i32, %c0_i32_0 : i32, i32, i32
  }
  func.func @transform_1(%arg0: i32) -> (i32, i32) {
    %c0_i32 = arith.constant 0 : i32
    %c0_i32_0 = arith.constant 0 : i32
    %c0_i32_1 = arith.constant 0 : i32
    return %c0_i32, %c0_i32_0 : i32, i32
  }
  func.func @transform_2(%arg0: i32) -> (i32, i32) {
    %c0_i32 = arith.constant 0 : i32
    %c0_i32_0 = arith.constant 0 : i32
    %c0_i32_1 = arith.constant 0 : i32
    return %c0_i32, %c0_i32_0 : i32, i32
  }
  func.func @transform_3(%arg0: i32) -> (i32, i32) {
    %c0_i32 = arith.constant 0 : i32
    %c0_i32_0 = arith.constant 0 : i32
    %c0_i32_1 = arith.constant 0 : i32
    return %c0_i32, %c0_i32_0 : i32, i32
  }
  func.func @transform_4(%arg0: i32) -> (i32, i32) {
    %c0_i32 = arith.constant 0 : i32
    %c0_i32_0 = arith.constant 0 : i32
    %c0_i32_1 = arith.constant 0 : i32
    return %c0_i32, %c0_i32_0 : i32, i32
  }
  func.func @transform_5(%arg0: i32) -> (i32, i32, i32) {
    %c0_i32 = arith.constant 0 : i32
    %c0_i32_0 = arith.constant 0 : i32
    %c0_i32_1 = arith.constant 0 : i32
    return %arg0, %c0_i32, %c0_i32_0 : i32, i32, i32
  }
}

</mosaic_0001>

<bundles_post_ra>
// kernel: eegnet_forward.1
= control target key start
LH: loop header
LB: loop body
LE: loop exit
PB: predicated region body
PF: predicated region fallthrough
CT: control target
= control target key end

     0   :  { %10 = vsyncpa [#allocation3], 0  ;;  %s3002_s0 = inlined_call_operand.vmem [shape: bf16[1,256,128], index: 0, kind: input, shape index: {}]   ;;  %s3003_s1 = inlined_call_operand.vmem [shape: bf16[96,256], index: 1, kind: input, shape index: {}]   ;;  %s3004_s2 = inlined_call_operand.hbm [shape: f32[96,96], index: 2, kind: input, shape index: {}]   ;;  %s3005_s3 = inlined_call_operand.vmem [shape: f32[96,512], index: 3, kind: input, shape index: {}]   ;;  %s3006_s4 = inlined_call_operand.hbm [shape: f32[128,512], index: 4, kind: input, shape index: {}]   ;;  %s3007_s5 = inlined_call_operand.vmem [shape: f32[1,4,4], index: 5, kind: output, shape index: {}]  }
   0x1   :  { %s20_s20 = sshll.u32 %s3004_s2, 4  ;;  %s21_s20 = int_to_ptr.hbm [resolvable:$true] %s20_s20 }
   0x2   :  { %11 = vsyncpa [#allocation5], 0  ;;  %s2206_s21 = smov [#allocation2]   ;;  %s35_s25 = sshll.u32 %s3006_s4, 4  ;;  %s36_s25 = int_to_ptr.hbm [resolvable:$true] %s35_s25 }
   0x3   :  { %s22_s22 = sshll.u32 %s2206_s21, 4  ;;  %s2207_s26 = smov 128   ;;  %s23_s22 = int_to_ptr.vmem [resolvable:$true] %s22_s22 }
   0x4   :  { %s2208_s27 = smov 8   ;;  %s2209_s28 = smov [#allocation4]  }
   0x5   :  { %28 = dma.hbm_to_vmem [thread:$0]  %s21_s20, 1536, %s23_s22, [#allocation3], %s2207_s26, %s2207_s26, %s2208_s27  }
   0x6   :  { %s37_s29 = sshll.u32 %s2209_s28, 4  ;;  %s2210_s30 = smov 512   ;;  %s38_s29 = int_to_ptr.vmem [resolvable:$true] %s37_s29 }
   0x7   :  { %s2211_s6 = smov 32  }
   0x8   :  { %43 = dma.hbm_to_vmem [thread:$0]  %s36_s25, 8192, %s38_s29, [#allocation5], %s2210_s30, %s2210_s30, %s2211_s6  }
   0x9   :  { %2202 = dma.done.wait [#allocation3], 1536  }
   0xa   :  { %2203 = vsyncadd [#allocation3], 4294965760 }
   0xb   :  { %2204 = dma.done.wait [#allocation5], 8192  }
   0xc   :  { %2205 = vsyncadd [#allocation5], 4294959104  ;;  %v2212_v0 = vmov 0   ;;  %v1983_v1 = vld [vmem:[%s3002_s0 + $0x38] sm:$0xff]  ;;  %v98_v3 = vld [vmem:[%s3005_s3 + $0x40] sm:$0xff]  ;;  %v2213_v60 = vmov 1  }
   0xd   :  { %2040 = vset.pattern.permute.xlu1 %v2212_v0  ;;  %2039 = vset.pattern.permute.xlu0 %v2212_v0  ;;  %v1991_v2 = vld [vmem:[%s3002_s0 + $0x78] sm:$0xff]  ;;  %v1982_v4 = vld [vmem:[%s3002_s0 + $0x30] sm:$0xff]  ;;  %v96_v6 = vld [vmem:[%s3005_s3] sm:$0xff]  ;;  %s2216_s25 = smov 96   ;;  %s2217_s26 = smov 64   ;;  %vm1071_vm12 = vcmask 785408  }
   0xe   :  { %2041 = vset.pattern.permute.xlu2 %v2212_v0  ;;  %120 = vperm.xlu1 %2040, %v98_v3   ;;  %v1990_v5 = vld [vmem:[%s3002_s0 + $0x70] sm:$0xff]  ;;  %v1981_v7 = vld [vmem:[%s3002_s0 + $0x28] sm:$0xff]  ;;  %v99_v9 = vld [vmem:[%s3005_s3 + $0x60] sm:$0xff]  ;;  %vm1237_vm13 = vcmask 261120   ;;  %s2218_s4 = smov 116   ;;  %s2220_s9 = smov 120  }
   0xf   :  { %324 = vmatpush.bf16.msra.mxu0 %v1983_v1  ;;  %363 = vmatpush.bf16.msra.mxu1 %v1991_v2  ;;  %v1989_v8 = vld [vmem:[%s3002_s0 + $0x68] sm:$0xff]  ;;  %v100_v10 = vld [vmem:[%s3005_s3 + $0x80] sm:$0xff]  ;;  %v1979_v14 = vld [vmem:[%s3002_s0 + $0x18] sm:$0xff] }
  0x10   :  { %2004 = vmatpush.bf16.msra.mxu2 %v1991_v2  ;;  %110 = vperm.xlu0 %2039, %v96_v6   ;;  %v1980_v11 = vld [vmem:[%s3002_s0 + $0x20] sm:$0xff]  ;;  %v1987_v15 = vld [vmem:[%s3002_s0 + $0x58] sm:$0xff]  ;;  %v1978_v18 = vld [vmem:[%s3002_s0 + $0x10] sm:$0xff]  ;;  %v2214_v6 = vmov 2  }
  0x11   :  { %v1988_v12 = vld [vmem:[%s3002_s0 + $0x60] sm:$0xff]  ;;  %130 = vperm.xlu2 %2041, %v100_v10   ;;  %v1986_v19 = vld [vmem:[%s3002_s0 + $0x50] sm:$0xff]  ;;  %v1977_v21 = vld [vmem:[%s3002_s0 + $0x8] sm:$0xff] }
  0x12   :  { %v97_v13 = vld [vmem:[%s3005_s3 + $0x20] sm:$0xff]  ;;  %v1985_v22 = vld [vmem:[%s3002_s0 + $0x48] sm:$0xff]  ;;  %v1825_v38 = vld [vmem:[%s3003_s1 + $0x10] sm:$0xf] }
  0x13   :  { %325 = vmatpush.bf16.msra.mxu0 %v1982_v4  ;;  %364 = vmatpush.bf16.msra.mxu1 %v1990_v5  ;;  %v103_v16 = vld [vmem:[%s3005_s3 + $0xe0] sm:$0xff]  ;;  %v1993_v28 = vld [vmem:[%s3003_s1 + $0x4] sm:$0xf0]  ;;  %v1819_v30 = vld [vmem:[%s3003_s1 + $0x8] sm:$0xf0] }
  0x14   :  { %2005 = vmatpush.bf16.msra.mxu2 %v1990_v5  ;;  %v101_v17 = vld [vmem:[%s3005_s3 + $0xa0] sm:$0xff]  ;;  %v2357_v34 = vld [vmem:[%s3005_s3 + $0x28] sm:$0xff]  ;;  %v1995_v39 = vld [vmem:[%s3003_s1 + $0x14] sm:$0xf0] }
  0x15   :  { %v102_v20 = vld [vmem:[%s3005_s3 + $0xc0] sm:$0xff]  ;;  %v2366_v36 = vld [vmem:[%s3005_s3 + $0x88] sm:$0xff]  ;;  %v1994_v40 = vld [vmem:[%s3003_s1 + $0x14] sm:$0xf]  ;;  %v1826_v42 = vor.u32 %v1995_v39, %v1825_v38 }
  0x16   :  { %125 = vperm.xlu1 %2040, %v99_v9   ;;  %v106_v23 = vld [vmem:[%s3005_s3 + $0x140] sm:$0xff]  ;;  %v2371_v37 = vld [vmem:[%s3005_s3 + $0x48] sm:$0xff]  ;;  %v1827_v41 = vld [vmem:[%s3003_s1 + $0x18] sm:$0xf0]  ;;  %v2215_v9 = vmov 3  }
  0x17   :  { %326 = vmatpush.bf16.msra.mxu0 %v1981_v7  ;;  %365 = vmatpush.bf16.msra.mxu1 %v1989_v8  ;;  %v1976_v24 = vld [vmem:[%s3002_s0] sm:$0xff]  ;;  %v1830_v43 = vor.u32 %v1994_v40, %v1827_v41  ;;  %v2390_v44 = vld [vmem:[%s3005_s3 + $0xe8] sm:$0xff]  ;;  %v2002_v58 = vld [vmem:[%s3003_s1 + $0x54] sm:$0xf] }
  0x18   :  { %2006 = vmatpush.bf16.msra.mxu2 %v1989_v8  ;;  %115 = vperm.xlu0 %2039, %v97_v13   ;;  %v104_v25 = vld [vmem:[%s3005_s3 + $0x100] sm:$0xff]  ;;  %v2395_v45 = vld [vmem:[%s3005_s3 + $0xa8] sm:$0xff]  ;;  %v1859_v59 = vld [vmem:[%s3003_s1 + $0x58] sm:$0xf0] }
  0x19   :  { %135 = vperm.xlu2 %2041, %v101_v17   ;;  %v1984_v26 = vld [vmem:[%s3002_s0 + $0x40] sm:$0xff]  ;;  %v1851_v47 = vld [vmem:[%s3003_s1 + $0x48] sm:$0xf0]  ;;  %v1997_v52 = vld [vmem:[%s3003_s1 + $0x24] sm:$0xf0]  ;;  %v1862_v61 = vor.u32 %v2002_v58, %v1859_v59 }
  0x1a   :  { %v1817_v27 = vld [vmem:[%s3003_s1] sm:$0xf]  ;;  %v1992_v29 = vld [vmem:[%s3003_s1 + $0x4] sm:$0xf]  ;;  %v553_v49 = vld [vmem:[%s3005_s3 + $0x148] sm:$0xff] }
  0x1b   :  { %327 = vmatpush.bf16.msra.mxu0 %v1980_v11  ;;  %366 = vmatpush.bf16.msra.mxu1 %v1988_v12  ;;  %v105_v31 = vld [vmem:[%s3005_s3 + $0x120] sm:$0xff]  ;;  %v1818_v32 = vor.u32 %v1993_v28, %v1817_v27  ;;  %v1822_v33 = vor.u32 %v1992_v29, %v1819_v30  ;;  %v2411_v50 = vld [vmem:[%s3005_s3 + $0x108] sm:$0xff]  ;;  %v1841_v63 = vld [vmem:[%s3003_s1 + $0x30] sm:$0xf] }
  0x1c   :  { %2007 = vmatpush.bf16.msra.mxu2 %v1988_v12  ;;  %v107_v35 = vld [vmem:[%s3005_s3 + $0x160] sm:$0xff]  ;;  %v1835_v54 = vld [vmem:[%s3003_s1 + $0x28] sm:$0xf0]  ;;  %v1999_v1 = vld [vmem:[%s3003_s1 + $0x34] sm:$0xf0] }
  0x1d   :  { %v2000_v46 = vld [vmem:[%s3003_s1 + $0x44] sm:$0xf]  ;;  %v1833_v51 = vld [vmem:[%s3003_s1 + $0x20] sm:$0xf]  ;;  %v2429_v57 = vld [vmem:[%s3005_s3 + $0x168] sm:$0xff]  ;;  %v1842_v4 = vor.u32 %v1999_v1, %v1841_v63 }
  0x1e   :  { %145 = vperm.xlu1 %2040, %v103_v16   ;;  %v1854_v48 = vor.u32 %v2000_v46, %v1851_v47  ;;  %v1996_v53 = vld [vmem:[%s3003_s1 + $0x24] sm:$0xf]  ;;  %v1834_v55 = vor.u32 %v1997_v52, %v1833_v51  ;;  %v2442_v62 = vld [vmem:[%s3005_s3 + $0x128] sm:$0xff]  ;;  %v1998_v2 = vld [vmem:[%s3003_s1 + $0x34] sm:$0xf] }
  0x1f   :  { %328 = vmatpush.bf16.msra.mxu0 %v1979_v14  ;;  %367 = vmatpush.bf16.msra.mxu1 %v1987_v15  ;;  %v1838_v56 = vor.u32 %v1996_v53, %v1835_v54  ;;  %v1843_v3 = vld [vmem:[%s3003_s1 + $0x38] sm:$0xf0]  ;;  %v1849_v7 = vld [vmem:[%s3003_s1 + $0x40] sm:$0xf]  ;;  %v2001_v8 = vld [vmem:[%s3003_s1 + $0x44] sm:$0xf0] }
  0x20   :  { %2008 = vmatpush.bf16.msra.mxu2 %v1987_v15  ;;  %140 = vperm.xlu0 %2039, %v102_v20   ;;  %v1846_v5 = vor.u32 %v1998_v2, %v1843_v3  ;;  %v1850_v10 = vor.u32 %v2001_v8, %v1849_v7  ;;  %v2473_v11 = vld [vmem:[%s3005_s3 + $0x68] sm:$0xff]  ;;  %v1857_v12 = vld [vmem:[%s3003_s1 + $0x50] sm:$0xf]  ;;  %v2003_v13 = vld [vmem:[%s3003_s1 + $0x54] sm:$0xf0] }
  0x21   :  { %150 = vperm.xlu2 %2041, %v104_v25   ;;  %v489_v14 = vld [vmem:[#allocation4 + $0x1e0] sm:$0xff]  ;;  %v1858_v15 = vor.u32 %v2003_v13, %v1857_v12  ;;  %v2492_v17 = vld [vmem:[%s3005_s3 + $0xc8] sm:$0xff] }
  0x22   :  { %v488_v16 = vld [vmem:[#allocation4 + $0x1c0] sm:$0xff] }
  0x23   :  { %329 = vmatpush.bf16.msra.mxu0 %v1978_v18  ;;  %368 = vmatpush.bf16.msra.mxu1 %v1986_v19  ;;  %v487_v18 = vld [vmem:[#allocation4 + $0x1a0] sm:$0xff] }
  0x24   :  { %2009 = vmatpush.bf16.msra.mxu2 %v1986_v19  ;;  %v486_v19 = vld [vmem:[#allocation4 + $0x180] sm:$0xff] }
  0x25   :  { %v485_v20 = vld [vmem:[#allocation4 + $0x160] sm:$0xff] }
  0x26   :  { %160 = vperm.xlu1 %2040, %v106_v23   ;;  %v2504_v23 = vld [vmem:[%s3005_s3 + $0x8] sm:$0xff]  ;;  %v481_v25 = vld [vmem:[#allocation4 + $0xe0] sm:$0xff] }
  0x27   :  { %330 = vmatpush.bf16.msra.mxu0 %v1977_v21  ;;  %369 = vmatpush.bf16.msra.mxu1 %v1985_v22  ;;  %v484_v21 = vld [vmem:[#allocation4 + $0x140] sm:$0xff] }
  0x28   :  { %2010 = vmatpush.bf16.msra.mxu2 %v1985_v22  ;;  %155 = vperm.xlu0 %2039, %v105_v31   ;;  %v483_v22 = vld [vmem:[#allocation4 + $0x120] sm:$0xff] }
  0x29   :  { %165 = vperm.xlu2 %2041, %v107_v35   ;;  %v479_v27 = vld [vmem:[#allocation4 + $0xa0] sm:$0xff] }
  0x2a   :  { %v478_v28 = vld [vmem:[#allocation4 + $0x80] sm:$0xff] }
  0x2b   :  { %331 = vmatpush.bf16.msra.mxu0 %v1976_v24  ;;  %370 = vmatpush.bf16.msra.mxu1 %v1984_v26  ;;  %v482_v24 = vld [vmem:[#allocation4 + $0x100] sm:$0xff] }
  0x2c   :  { %2011 = vmatpush.bf16.msra.mxu2 %v1984_v26  ;;  %v480_v26 = vld [vmem:[#allocation4 + $0xc0] sm:$0xff] }
  0x2d   :  { %v477_v29 = vld [vmem:[#allocation4 + $0x60] sm:$0xff] }
  0x2e   :  { %332 = vmatmul.bf16.vlgmr.msra.gmra.mxu0 %v1818_v32  ;;  %371 = vmatmul.bf16.vlgmr.msra.gmra.mxu1 %v1822_v33  ;;  %v476_v30 = vld [vmem:[#allocation4 + $0x40] sm:$0xff] }
  0x2f   :  { %562 = vperm.xlu1 %2040, %v2357_v34   ;;  %391 = vmatmul.bf16.vlgmr.msra.gmra.mxu2 %v1854_v48  ;;  %v475_v31 = vld [vmem:[#allocation4 + $0x20] sm:$0xff] }
  0x30   :  { %2046 = vset.pattern.permute.xlu0 %v2214_v6  ;;  %490 = vmatpush.msrb.mxu2 %v489_v14  ;;  %v474_v32 = vld [vmem:[#allocation4] sm:$0xff] }
  0x31   :  { %567 = vperm.xlu2 %2041, %v2371_v37   ;;  %780 = vperm.xlu0 %2046, %v2411_v50  }
  0x32   :  { %491 = vmatpush.msrb.mxu2 %v488_v16 }
  0x34   :  { %492 = vmatpush.msrb.mxu2 %v487_v18 }
  0x36   :  { %493 = vmatpush.msrb.mxu2 %v486_v19 }
  0x37   :  { %577 = vperm.xlu1 %2040, %v2366_v36  }
  0x38   :  { %494 = vmatpush.msrb.mxu2 %v485_v20 }
  0x39   :  { %582 = vperm.xlu2 %2041, %v2395_v45   ;;  %760 = vperm.xlu0 %2046, %v2473_v11  }
  0x3a   :  { %495 = vmatpush.msrb.mxu2 %v484_v21 }
  0x3c   :  { %496 = vmatpush.msrb.mxu2 %v483_v22 }
  0x3e   :  { %337 = vmatmul.bf16.gmra.mxu0 %v1826_v42  ;;  %376 = vmatmul.bf16.gmra.mxu1 %v1830_v43 }
  0x3f   :  { %592 = vperm.xlu1 %2040, %v2390_v44   ;;  %396 = vmatmul.bf16.gmra.mxu2 %v1862_v61 }
  0x40   :  { %497 = vmatpush.msrb.mxu2 %v482_v24 }
  0x41   :  { %597 = vperm.xlu2 %2041, %v2411_v50   ;;  %2053 = vset.pattern.permute.xlu0 %v2213_v60 }
  0x42   :  { %672 = vperm.xlu0 %2053, %v2429_v57   ;;  %498 = vmatpush.msrb.mxu2 %v481_v25 }
  0x44   :  { %499 = vmatpush.msrb.mxu2 %v480_v26 }
  0x46   :  { %500 = vmatpush.msrb.mxu2 %v479_v27 }
  0x47   :  { %607 = vperm.xlu1 %2040, %v553_v49  }
  0x48   :  { %501 = vmatpush.msrb.mxu2 %v478_v28 }
  0x49   :  { %612 = vperm.xlu2 %2041, %v2429_v57  }
  0x4a   :  { %648 = vperm.xlu0 %2053, %v2395_v45   ;;  %502 = vmatpush.msrb.mxu2 %v477_v29 }
  0x4c   :  { %503 = vmatpush.msrb.mxu2 %v476_v30 }
  0x4e   :  { %342 = vmatmul.bf16.gmra.mxu0 %v1834_v55  ;;  %381 = vmatmul.bf16.gmra.mxu1 %v1838_v56 }
  0x4f   :  { %2042 = vset.pattern.permute.xlu1 %v2213_v60  ;;  %504 = vmatpush.msrb.mxu2 %v475_v31 }
  0x50   :  { %668 = vperm.xlu1 %2042, %v553_v49  }
  0x51   :  { %2043 = vset.pattern.permute.xlu2 %v2214_v6  ;;  %505 = vmatpush.msrb.mxu2 %v474_v32 }
  0x52   :  { %792 = vperm.xlu2 %2043, %v2429_v57   ;;  %628 = vperm.xlu0 %2053, %v2504_v23  }
  0x58   :  { %664 = vperm.xlu1 %2042, %v2442_v62  }
  0x5a   :  { %788 = vperm.xlu2 %2043, %v553_v49   ;;  %2056 = vset.pattern.permute.xlu0 %v2215_v9 }
  0x5b   :  { %912 = vperm.xlu0 %2056, %v2429_v57  }
  0x5e   :  { %347 = vmatmul.bf16.gmra.mxu0 %v1842_v4  ;;  %386 = vmatmul.bf16.gmra.mxu1 %v1846_v5 }
  0x60   :  { %660 = vperm.xlu1 %2042, %v2411_v50  }
  0x62   :  { %784 = vperm.xlu2 %2043, %v2442_v62  }
  0x63   :  { %892 = vperm.xlu0 %2056, %v2492_v17  }
  0x68   :  { %2044 = vset.pattern.permute.xlu1 %v2215_v9 }
  0x69   :  { %908 = vperm.xlu1 %2044, %v553_v49  }
  0x6a   :  { %2045 = vset.pattern.permute.xlu2 %v2213_v60 }
  0x6b   :  { %656 = vperm.xlu2 %2045, %v2390_v44   ;;  %868 = vperm.xlu0 %2056, %v2504_v23   ;;  %v2519_v33 = vpop.permute.xlu2 %130 }
  0x6e   :  { %352 = vmatmul.bf16.gmra.mxu0 %v1850_v10 }
  0x71   :  { %904 = vperm.xlu1 %2044, %v2442_v62  }
  0x73   :  { %652 = vperm.xlu2 %2045, %v2492_v17   ;;  %2057 = vset.pattern.permute.xlu0 %v2212_v0  ;;  %v2527_v43 = vpop.permute.xlu2 %135 }
  0x74   :  { %557 = vperm.xlu0 %2057, %v2504_v23  }
  0x79   :  { %2047 = vset.pattern.permute.xlu1 %v2214_v6 }
  0x7a   :  { %776 = vperm.xlu1 %2047, %v2390_v44  }
  0x7b   :  { %2048 = vset.pattern.permute.xlu2 %v2215_v9  ;;  %v2532_v57 = vpop.permute.xlu2 %150 }
  0x7c   :  { %900 = vperm.xlu2 %2048, %v2411_v50   ;;  %572 = vperm.xlu0 %2057, %v2473_v11  }
  0x7e   :  { %357 = vmatmul.bf16.gmra.mxu0 %v1858_v15 }
  0x80   :  { %v121_v41 = vpop.permute.xlu1 %120 }
  0x82   :  { %772 = vperm.xlu1 %2047, %v2492_v17   ;;  %v111_v35 = vpop.permute.xlu0 %110 }
  0x83   :  { %v2541_v12 = vpop.permute.xlu2 %165 }
  0x84   :  { %896 = vperm.xlu2 %2048, %v2390_v44   ;;  %587 = vperm.xlu0 %2057, %v2492_v17  }
  0x88   :  { %v126_v50 = vpop.permute.xlu1 %125 }
  0x8a   :  { %2049 = vset.pattern.permute.xlu1 %v2213_v60  ;;  %v116_v44 = vpop.permute.xlu0 %115 }
  0x8b   :  { %644 = vperm.xlu1 %2049, %v2366_v36  }
  0x8c   :  { %2050 = vset.pattern.permute.xlu2 %v2214_v6  ;;  %602 = vperm.xlu0 %2057, %v2442_v62  }
  0x8d   :  { %768 = vperm.xlu2 %2050, %v2395_v45  }
  0x90   :  { %v2538_v2 = vpop.permute.xlu1 %145 }
  0x93   :  { %640 = vperm.xlu1 %2049, %v2473_v11  }
  0x95   :  { %764 = vperm.xlu2 %2050, %v2366_v36  }
  0x98   :  { %v2546_v20 = vpop.permute.xlu1 %160 }
  0x9b   :  { %2051 = vset.pattern.permute.xlu1 %v2215_v9 }
  0x9c   :  { %888 = vperm.xlu1 %2051, %v2395_v45  }
  0x9d   :  { %2052 = vset.pattern.permute.xlu2 %v2213_v60 }
  0x9e   :  { %636 = vperm.xlu2 %2052, %v2371_v37  }
  0xa1   :  { %v2553_v31 = vpop.permute.xlu1 %562 }
  0xa4   :  { %884 = vperm.xlu1 %2051, %v2366_v36  }
  0xa6   :  { %632 = vperm.xlu2 %2052, %v2357_v34  }
  0xab   :  { %v333_v38 = vpop.f32.mrf.mxu0  ;;  %v372_v39 = vpop.f32.mrf.mxu1 }
  0xac   :  { %v334_v40 = vadd.f32 %v333_v38, %v111_v35  ;;  %2054 = vset.pattern.permute.xlu1 %v2214_v6 }
  0xad   :  { %756 = vperm.xlu1 %2054, %v2371_v37  }
  0xae   :  { %v373_v42 = vadd.f32 %v372_v39, %v334_v40  ;;  %2055 = vset.pattern.permute.xlu2 %v2215_v9 }
  0xaf   :  { %880 = vperm.xlu2 %2055, %v2473_v11  }
  0xb0   :  { %v414_v36 = vmin.f32 %v373_v42, 0.0  ;;  %vm402_vm0 = vcmp.gt.f32.partialorder %v373_v42, 0.0 }
  0xb2   :  { %v426_v45 = vmul.f32 1.442695, %v414_v36 }
  0xb3   :  { %v335_v46 = vpop.f32.mrf.mxu0  ;;  %v374_v47 = vpop.f32.mrf.mxu1 }
  0xb4   :  { %2102 = vpow2.f32 %v426_v45  ;;  %v336_v48 = vadd.f32 %v335_v46, %v116_v44  ;;  %v2557_v45 = vpop.permute.xlu1 %577 }
  0xb5   :  { %752 = vperm.xlu1 %2054, %v2357_v34  }
  0xb6   :  { %v375_v49 = vadd.f32 %v374_v47, %v336_v48 }
  0xb7   :  { %876 = vperm.xlu2 %2055, %v2371_v37   ;;  %v2549_v37 = vpop.permute.xlu2 %567 }
  0xb8   :  { %v415_v51 = vmin.f32 %v375_v49, 0.0  ;;  %vm403_vm1 = vcmp.gt.f32.partialorder %v375_v49, 0.0 }
  0xba   :  { %v2103_v52 = vpop.eup %2102  ;;  %v428_v53 = vmul.f32 1.442695, %v415_v51 }
  0xbb   :  { %v338_v54 = vpop.f32.mrf.mxu0  ;;  %v377_v55 = vpop.f32.mrf.mxu1  ;;  %v1927_v56 = vadd.f32 -1.0, %v2103_v52 }
  0xbc   :  { %2104 = vpow2.f32 %v428_v53  ;;  %v339_v58 = vadd.f32 %v338_v54, %v121_v41 }
  0xbd   :  { %v462_v59 = vsel %vm402_vm0, %v373_v42, %v1927_v56  ;;  %748 = vperm.xlu1 %2054, %v2504_v23   ;;  %v392_v56 = vpop.f32.mrf.mxu2 }
  0xbe   :  { %v378_v61 = vadd.f32 %v377_v55, %v339_v58  ;;  %506 = vmatmul.f32.vlgmr.msrb.gmra.mxu2 %v462_v59 }
  0xbf   :  { %872 = vperm.xlu2 %2055, %v2357_v34   ;;  %v2555_v35 = vpop.permute.xlu2 %582 }
  0xc0   :  { %v416_v63 = vmin.f32 %v378_v61, 0.0  ;;  %vm404_vm2 = vcmp.gt.f32.partialorder %v378_v61, 0.0 }
  0xc2   :  { %v2105_v1 = vpop.eup %2104  ;;  %v430_v3 = vmul.f32 1.442695, %v416_v63  ;;  %v2562_v63 = vpop.permute.xlu1 %592 }
  0xc3   :  { %v340_v4 = vpop.f32.mrf.mxu0  ;;  %v379_v5 = vpop.f32.mrf.mxu1  ;;  %v1928_v7 = vadd.f32 -1.0, %v2105_v1 }
  0xc4   :  { %2106 = vpow2.f32 %v430_v3  ;;  %v341_v8 = vadd.f32 %v340_v4, %v126_v50 }
  0xc5   :  { %v463_v10 = vsel %vm403_vm1, %v375_v49, %v1928_v7  ;;  %2059 = vset.pattern.permute.xlu1 %v2212_v0 }
  0xc6   :  { %v380_v13 = vadd.f32 %v379_v5, %v341_v8  ;;  %509 = vmatmul.f32.gmra.mxu2 %v463_v10 }
  0xc7   :  { %2058 = vset.pattern.permute.xlu2 %v2212_v0  ;;  %v2560_v51 = vpop.permute.xlu2 %597 }
  0xc8   :  { %v417_v11 = vmin.f32 %v380_v13, 0.0  ;;  %vm405_vm3 = vcmp.gt.f32.partialorder %v380_v13, 0.0 }
  0xca   :  { %v2107_v14 = vpop.eup %2106  ;;  %v432_v15 = vmul.f32 1.442695, %v417_v11 }
  0xcb   :  { %v343_v16 = vpop.f32.mrf.mxu0  ;;  %v382_v17 = vpop.f32.mrf.mxu1  ;;  %v1929_v18 = vadd.f32 -1.0, %v2107_v14 }
  0xcc   :  { %2108 = vpow2.f32 %v432_v15  ;;  %v344_v19 = vadd.f32 %v343_v16, %v2519_v33  ;;  %v141_v33 = vpop.permute.xlu0 %140 }
  0xcd   :  { %v464_v21 = vsel %vm404_vm2, %v378_v61, %v1929_v18  ;;  %v2569_v18 = vpop.permute.xlu1 %607 }
  0xce   :  { %v383_v22 = vadd.f32 %v382_v17, %v344_v19  ;;  %512 = vmatmul.f32.gmra.mxu2 %v464_v21 }
  0xcf   :  { %v2565_v7 = vpop.permute.xlu2 %612 }
  0xd0   :  { %v418_v62 = vmin.f32 %v383_v22, 0.0  ;;  %vm406_vm4 = vcmp.gt.f32.partialorder %v383_v22, 0.0 }
  0xd2   :  { %v2109_v23 = vpop.eup %2108  ;;  %v434_v24 = vmul.f32 1.442695, %v418_v62 }
  0xd3   :  { %v345_v25 = vpop.f32.mrf.mxu0  ;;  %v384_v26 = vpop.f32.mrf.mxu1  ;;  %v1930_v27 = vadd.f32 -1.0, %v2109_v23 }
  0xd4   :  { %2110 = vpow2.f32 %v434_v24  ;;  %v346_v28 = vadd.f32 %v345_v25, %v2527_v43  ;;  %v156_v55 = vpop.permute.xlu0 %155 }
  0xd5   :  { %v465_v29 = vsel %vm405_vm3, %v380_v13, %v1930_v27  ;;  %v394_v13 = vpop.f32.mrf.mxu2 }
  0xd6   :  { %v385_v30 = vadd.f32 %v384_v26, %v346_v28  ;;  %515 = vmatmul.f32.gmra.mxu2 %v465_v29  ;;  %v2576_v29 = vpop.permute.xlu1 %668 }
  0xd7   :  { %v2571_v21 = vpop.permute.xlu2 %792 }
  0xd8   :  { %v419_v34 = vmin.f32 %v385_v30, 0.0  ;;  %vm407_vm5 = vcmp.gt.f32.partialorder %v385_v30, 0.0 }
  0xda   :  { %v2111_v32 = vpop.eup %2110  ;;  %v436_v38 = vmul.f32 1.442695, %v419_v34 }
  0xdb   :  { %v348_v39 = vpop.f32.mrf.mxu0  ;;  %v387_v40 = vpop.f32.mrf.mxu1  ;;  %v1931_v41 = vadd.f32 -1.0, %v2111_v32 }
  0xdc   :  { %2112 = vpow2.f32 %v436_v38  ;;  %v349_v42 = vadd.f32 %v348_v39, %v141_v33  ;;  %v2567_v8 = vpop.permute.xlu0 %780 }
  0xdd   :  { %v466_v36 = vsel %vm406_vm4, %v383_v22, %v1931_v41  ;;  %v397_v25 = vpop.f32.mrf.mxu2 }
  0xde   :  { %v388_v43 = vadd.f32 %v387_v40, %v349_v42  ;;  %518 = vmatmul.f32.gmra.mxu2 %v466_v36 }
  0xdf   :  { %v2578_v33 = vpop.permute.xlu2 %788 }
  0xe0   :  { %v420_v44 = vmin.f32 %v388_v43, 0.0  ;;  %vm408_vm6 = vcmp.gt.f32.partialorder %v388_v43, 0.0 }
  0xe2   :  { %v2113_v46 = vpop.eup %2112  ;;  %v438_v47 = vmul.f32 1.442695, %v420_v44 }
  0xe3   :  { %v350_v48 = vpop.f32.mrf.mxu0  ;;  %v1932_v49 = vadd.f32 -1.0, %v2113_v46  ;;  %v389_v52 = vpop.f32.mrf.mxu1 }
  0xe4   :  { %2114 = vpow2.f32 %v438_v47  ;;  %v351_v50 = vadd.f32 %v350_v48, %v2538_v2  ;;  %v2573_v62 = vpop.permute.xlu0 %760  ;;  %v2583_v46 = vpop.permute.xlu1 %664 }
  0xe5   :  { %v467_v53 = vsel %vm407_vm5, %v385_v30, %v1932_v49 }
  0xe6   :  { %v390_v54 = vadd.f32 %v389_v52, %v351_v50  ;;  %521 = vmatmul.f32.gmra.mxu2 %v467_v53 }
  0xe7   :  { %v2585_v50 = vpop.permute.xlu2 %784 }
  0xe8   :  { %v421_v58 = vmin.f32 %v390_v54, 0.0  ;;  %vm409_vm7 = vcmp.gt.f32.partialorder %v390_v54, 0.0 }
  0xea   :  { %v2115_v59 = vpop.eup %2114  ;;  %v440_v61 = vmul.f32 1.442695, %v421_v58 }
  0xeb   :  { %v353_v1 = vpop.f32.mrf.mxu0  ;;  %v1933_v3 = vadd.f32 -1.0, %v2115_v59 }
  0xec   :  { %2116 = vpow2.f32 %v440_v61  ;;  %v354_v4 = vadd.f32 %v353_v1, %v2532_v57  ;;  %v2580_v42 = vpop.permute.xlu0 %672 }
  0xed   :  { %v468_v2 = vsel %vm408_vm6, %v388_v43, %v1933_v3 }
  0xee   :  { %v393_v5 = vadd.f32 %v392_v56, %v354_v4  ;;  %524 = vmatmul.f32.gmra.mxu2 %v468_v2 }
  0xef   :  { %v2589_v58 = vpop.permute.xlu2 %656 }
  0xf0   :  { %v422_v10 = vmin.f32 %v393_v5, 0.0  ;;  %vm410_vm8 = vcmp.gt.f32.partialorder %v393_v5, 0.0 }
  0xf2   :  { %v2117_v11 = vpop.eup %2116  ;;  %v442_v14 = vmul.f32 1.442695, %v422_v10 }
  0xf3   :  { %v355_v15 = vpop.f32.mrf.mxu0  ;;  %v1934_v16 = vadd.f32 -1.0, %v2117_v11 }
  0xf4   :  { %v356_v17 = vadd.f32 %v355_v15, %v156_v55  ;;  %2118 = vpow2.f32 %v442_v14 }
  0xf5   :  { %v469_v57 = vsel %vm409_vm7, %v390_v54, %v1934_v16  ;;  %v649_v54 = vpop.permute.xlu0 %648 }
  0xf6   :  { %v395_v19 = vadd.f32 %v394_v13, %v356_v17  ;;  %527 = vmatmul.f32.gmra.mxu2 %v469_v57 }
  0xf7   :  { %v653_v3 = vpop.permute.xlu2 %652 }
  0xf8   :  { %v423_v22 = vmin.f32 %v395_v19, 0.0  ;;  %vm411_vm9 = vcmp.gt.f32.partialorder %v395_v19, 0.0 }
  0xfa   :  { %v2119_v23 = vpop.eup %2118  ;;  %v444_v24 = vmul.f32 1.442695, %v423_v22 }
  0xfb   :  { %v358_v26 = vpop.f32.mrf.mxu0  ;;  %v1935_v27 = vadd.f32 -1.0, %v2119_v23 }
  0xfc   :  { %v359_v28 = vadd.f32 %v358_v26, %v2546_v20  ;;  %2120 = vpow2.f32 %v444_v24  ;;  %v399_v20 = vpop.f32.mrf.mxu2 }
  0xfd   :  { %v470_v30 = vsel %vm410_vm8, %v393_v5, %v1935_v27  ;;  %v629_v61 = vpop.permute.xlu0 %628 }
  0xfe   :  { %v398_v34 = vadd.f32 %v397_v25, %v359_v28  ;;  %530 = vmatmul.f32.gmra.mxu2 %v470_v30 }
  0xff   :  { %v901_v5 = vpop.permute.xlu2 %900 }
 0x100   :  { %v424_v32 = vmin.f32 %v398_v34, 0.0  ;;  %vm412_vm10 = vcmp.gt.f32.partialorder %v398_v34, 0.0 }
 0x102   :  { %v2121_v38 = vpop.eup %2120  ;;  %v446_v39 = vmul.f32 1.442695, %v424_v32 }
 0x103   :  { %v360_v40 = vpop.f32.mrf.mxu0  ;;  %v1936_v41 = vadd.f32 -1.0, %v2121_v38 }
 0x104   :  { %v361_v36 = vadd.f32 %v360_v40, %v2541_v12  ;;  %2122 = vpow2.f32 %v446_v39  ;;  %v2587_v12 = vpop.permute.xlu1 %660 }
 0x105   :  { %v471_v43 = vsel %vm411_vm9, %v395_v19, %v1936_v41  ;;  %v2593_v4 = vpop.permute.xlu0 %912 }
 0x106   :  { %v400_v44 = vadd.f32 %v399_v20, %v361_v36  ;;  %533 = vmatmul.f32.gmra.mxu2 %v471_v43 }
 0x107   :  { %v897_v11 = vpop.permute.xlu2 %896 }
 0x108   :  { %v425_v47 = vmin.f32 %v400_v44, 0.0  ;;  %vm413_vm11 = vcmp.gt.f32.partialorder %v400_v44, 0.0 }
 0x10a   :  { %v2123_v48 = vpop.eup %2122  ;;  %v448_v49 = vmul.f32 1.442695, %v425_v47 }
 0x10b   :  { %v1937_v52 = vadd.f32 -1.0, %v2123_v48 }
 0x10c   :  { %2124 = vpow2.f32 %v448_v49  ;;  %v2591_v1 = vpop.permute.xlu1 %908 }
 0x10d   :  { %v472_v53 = vsel %vm412_vm10, %v398_v34, %v1937_v52  ;;  %v893_v10 = vpop.permute.xlu0 %892  ;;  %vm1796_vm10 = vcmask 27648  }
 0x10e   :  { %536 = vmatmul.f32.gmra.mxu2 %v472_v53 }
 0x10f   :  { %v769_v16 = vpop.permute.xlu2 %768 }
 0x112   :  { %v2125_v55 = vpop.eup %2124 }
 0x113   :  { %v1938_v56 = vadd.f32 -1.0, %v2125_v55 }
 0x114   :  { %v2595_v2 = vpop.permute.xlu1 %904 }
 0x115   :  { %v473_v59 = vsel %vm413_vm11, %v400_v44, %v1938_v56  ;;  %v2597_v14 = vpop.permute.xlu0 %868 }
 0x116   :  { %539 = vmatmul.f32.gmra.mxu2 %v473_v59 }
 0x117   :  { %v765_v24 = vpop.permute.xlu2 %764 }
 0x11c   :  { %v777_v13 = vpop.permute.xlu1 %776 }
 0x11d   :  { %v558_v17 = vpop.permute.xlu0 %557 }
 0x11f   :  { %v637_v27 = vpop.permute.xlu2 %636 }
 0x124   :  { %v773_v15 = vpop.permute.xlu1 %772 }
 0x125   :  { %v573_v32 = vpop.permute.xlu0 %572 }
 0x12c   :  { %v645_v23 = vpop.permute.xlu1 %644 }
 0x12d   :  { %v588_v53 = vpop.permute.xlu0 %587 }
 0x134   :  { %v641_v26 = vpop.permute.xlu1 %640 }
 0x13c   :  { %v889_v34 = vpop.permute.xlu1 %888 }
 0x141   :  { %v2599_v57 = vpop.f32.mrf.mxu2 }
 0x142   :  { %v2602_v19 = vmul.f32 %v629_v61, %v2599_v57  ;;  %v2605_v22 = vmul.f32 %v558_v17, %v2599_v57 }
 0x144   :  { %v885_v36 = vpop.permute.xlu1 %884 }
 0x149   :  { %v2607_v25 = vpop.f32.mrf.mxu2 }
 0x151   :  { %v2609_v28 = vpop.f32.mrf.mxu2 }
 0x152   :  { %v677_v30 = vmul.f32 %v637_v27, %v2609_v28 }
 0x154   :  { %703 = vrot.lane.b32.xlu2 %v677_v30, %s2216_s25 }
 0x159   :  { %v2613_v38 = vpop.f32.mrf.mxu2 }
 0x15a   :  { %v798_v39 = vmul.f32 %v2573_v62, %v2613_v38  ;;  %v678_v40 = vmul.f32 %v641_v26, %v2613_v38  ;;  %v2619_v41 = vmul.f32 %v573_v32, %v2613_v38 }
 0x15c   :  { %825 = vrot.lane.b32.xlu0 %v798_v39, %s2217_s26  ;;  %705 = vrot.lane.b32.xlu2 %v678_v40, %s2216_s25 }
 0x161   :  { %v2623_v20 = vpop.f32.mrf.mxu2 }
 0x162   :  { %v919_v43 = vmul.f32 %v885_v36, %v2623_v20  ;;  %v799_v44 = vmul.f32 %v765_v24, %v2623_v20  ;;  %v679_v47 = vmul.f32 %v645_v23, %v2623_v20 }
 0x164   :  { %947 = vrot.lane.b32.xlu1 %v919_v43, %s2211_s6  ;;  %827 = vrot.lane.b32.xlu0 %v799_v44, %s2217_s26 }
 0x165   :  { %707 = vrot.lane.b32.xlu2 %v679_v47, %s2216_s25 }
 0x169   :  { %v2631_v62 = vpop.f32.mrf.mxu2 }
 0x16a   :  { %v920_v48 = vmul.f32 %v889_v34, %v2631_v62  ;;  %v800_v49 = vmul.f32 %v769_v16, %v2631_v62  ;;  %v680_v52 = vmul.f32 %v649_v54, %v2631_v62 }
 0x16c   :  { %949 = vrot.lane.b32.xlu1 %v920_v48, %s2211_s6  ;;  %829 = vrot.lane.b32.xlu0 %v800_v49, %s2217_s26 }
 0x16d   :  { %709 = vrot.lane.b32.xlu2 %v680_v52, %s2216_s25 }
 0x171   :  { %v525_v55 = vpop.f32.mrf.mxu2 }
 0x172   :  { %v921_v56 = vmul.f32 %v893_v10, %v525_v55  ;;  %v801_v59 = vmul.f32 %v773_v15, %v525_v55  ;;  %v681_v61 = vmul.f32 %v653_v3, %v525_v55  ;;  %v2639_v17 = vmul.f32 %v588_v53, %v525_v55  ;;  %v1000_v55 = vld [vmem:[%s3005_s3 + $0x30] sm:$0xff] }
 0x174   :  { %951 = vrot.lane.b32.xlu1 %v921_v56, %s2211_s6  ;;  %831 = vrot.lane.b32.xlu0 %v801_v59, %s2217_s26 }
 0x175   :  { %711 = vrot.lane.b32.xlu2 %v681_v61, %s2216_s25  ;;  %v1005_v61 = vld [vmem:[%s3005_s3 + $0xd0] sm:$0xff] }
 0x179   :  { %v2644_v54 = vpop.f32.mrf.mxu2 }
 0x17a   :  { %v922_v16 = vmul.f32 %v897_v11, %v2644_v54  ;;  %v802_v23 = vmul.f32 %v777_v13, %v2644_v54  ;;  %v682_v24 = vmul.f32 %v2589_v58, %v2644_v54  ;;  %v603_v58 = vpop.permute.xlu0 %602  ;;  %v633_v13 = vpop.permute.xlu2 %632 }
 0x17b   :  { %v676_v36 = vmul.f32 %v633_v13, %v2607_v25 }
 0x17c   :  { %953 = vrot.lane.b32.xlu1 %v922_v16, %s2211_s6  ;;  %833 = vrot.lane.b32.xlu0 %v802_v23, %s2217_s26  ;;  %v1008_v16 = vld [vmem:[%s3005_s3 + $0x130] sm:$0xff] }
 0x17d   :  { %713 = vrot.lane.b32.xlu2 %v682_v24, %s2216_s25 }
 0x181   :  { %v2653_v3 = vpop.f32.mrf.mxu2 }
 0x182   :  { %v923_v10 = vmul.f32 %v901_v5, %v2653_v3  ;;  %v803_v15 = vmul.f32 %v2567_v8, %v2653_v3  ;;  %v683_v11 = vmul.f32 %v2587_v12, %v2653_v3  ;;  %v881_v12 = vpop.permute.xlu2 %880 }
 0x184   :  { %955 = vrot.lane.b32.xlu1 %v923_v10, %s2211_s6  ;;  %835 = vrot.lane.b32.xlu0 %v803_v15, %s2217_s26 }
 0x185   :  { %715 = vrot.lane.b32.xlu2 %v683_v11, %s2216_s25 }
 0x189   :  { %v534_v26 = vpop.f32.mrf.mxu2 }
 0x18a   :  { %v924_v27 = vmul.f32 %v2595_v2, %v534_v26  ;;  %v804_v30 = vmul.f32 %v2585_v50, %v534_v26  ;;  %v684_v5 = vmul.f32 %v2583_v46, %v534_v26  ;;  %v2666_v34 = vmul.f32 %v603_v58, %v534_v26  ;;  %v757_v50 = vpop.permute.xlu1 %756 }
 0x18c   :  { %957 = vrot.lane.b32.xlu1 %v924_v27, %s2211_s6  ;;  %837 = vrot.lane.b32.xlu0 %v804_v30, %s2217_s26 }
 0x18d   :  { %717 = vrot.lane.b32.xlu2 %v684_v5, %s2216_s25 }
 0x191   :  { %v2671_v8 = vpop.f32.mrf.mxu2 }
 0x192   :  { %v925_v32 = vmul.f32 %v2591_v1, %v2671_v8  ;;  %v805_v2 = vmul.f32 %v2578_v33, %v2671_v8  ;;  %v685_v46 = vmul.f32 %v2576_v29, %v2671_v8  ;;  %v797_v1 = vmul.f32 %v757_v50, %v2609_v28  ;;  %v877_v33 = vpop.permute.xlu2 %876  ;;  %v753_v29 = vpop.permute.xlu1 %752 }
 0x193   :  { %v796_v44 = vmul.f32 %v753_v29, %v2607_v25 }
 0x194   :  { %959 = vrot.lane.b32.xlu1 %v925_v32, %s2211_s6  ;;  %839 = vrot.lane.b32.xlu0 %v805_v2, %s2217_s26 }
 0x195   :  { %719 = vrot.lane.b32.xlu2 %v685_v46, %s2216_s25 }
 0x199   :  { %v2682_v39 = vpop.f32.mrf.mxu2 }
 0x19a   :  { %v686_v40 = vmul.f32 %v2580_v42, %v2682_v39  ;;  %v806_v43 = vmul.f32 %v2571_v21, %v2682_v39  ;;  %v873_v42 = vpop.permute.xlu2 %872  ;;  %v749_v47 = vpop.permute.xlu1 %748  ;;  %v926_v49 = vmul.f32 %v2593_v4, %v2682_v39  ;;  %v617_v21 = vmul.f32 %v2549_v37, %v2609_v28 }
 0x19b   :  { %v916_v48 = vmul.f32 %v873_v42, %v2607_v25  ;;  %v795_v52 = vmul.f32 %v749_v47, %v2599_v57  ;;  %v918_v4 = vmul.f32 %v881_v12, %v2613_v38  ;;  %v917_v37 = vmul.f32 %v877_v33, %v2609_v28 }
 0x19c   :  { %823 = vrot.lane.b32.xlu0 %v797_v1, %s2217_s26  ;;  %721 = vrot.lane.b32.xlu1 %v686_v40, %s2216_s25  ;;  %v915_v38 = vmul.f32 %v2597_v14, %v2599_v57  ;;  %v619_v28 = vmul.f32 %v2557_v45, %v2623_v20  ;;  %v620_v14 = vmul.f32 %v2555_v35, %v2631_v62 }
 0x19d   :  { %701 = vrot.lane.b32.xlu2 %v676_v36, %s2216_s25 }
 0x1a4   :  { %821 = vrot.lane.b32.xlu0 %v796_v44, %s2217_s26  ;;  %841 = vrot.lane.b32.xlu1 %v806_v43, %s2217_s26 }
 0x1a5   :  { %699 = vrot.lane.b32.xlu2 %v2602_v19, %s2216_s25 }
 0x1ac   :  { %941 = vrot.lane.b32.xlu0 %v916_v48, %s2211_s6  ;;  %961 = vrot.lane.b32.xlu1 %v926_v49, %s2211_s6 }
 0x1ad   :  { %819 = vrot.lane.b32.xlu2 %v795_v52, %s2217_s26 }
 0x1ae   :  { %v704_v53 = vpop.permute.xlu2 %703 }
 0x1af   :  { %v2707_v19 = vadd.f32 %v704_v53, %v617_v21  ;;  %v626_v21 = vmul.f32 %v2565_v7, %v2682_v39  ;;  %v999_v53 = vld [vmem:[%s3005_s3 + $0x10] sm:$0xff]  ;;  %v622_v7 = vmul.f32 %v2562_v63, %v2644_v54 }
 0x1b4   :  { %1018 = vperm.xlu0 %2057, %v1000_v55   ;;  %945 = vrot.lane.b32.xlu1 %v918_v4, %s2211_s6 }
 0x1b5   :  { %1013 = vperm.xlu2 %2058, %v999_v53   ;;  %v1234_v53 = vld [vmem:[#allocation4 + $0x28] sm:$0xff] }
 0x1b6   :  { %v706_v56 = vpop.permute.xlu2 %705 }
 0x1b7   :  { %v738_v59 = vadd.f32 %v706_v56, %v2619_v41 }
 0x1bc   :  { %1043 = vperm.xlu0 %2057, %v1005_v61   ;;  %943 = vrot.lane.b32.xlu1 %v917_v37, %s2211_s6 }
 0x1bf   :  { %v708_v41 = vpop.permute.xlu2 %707 }
 0x1c0   :  { %v739_v10 = vadd.f32 %v708_v41, %v619_v28 }
 0x1c4   :  { %1058 = vperm.xlu0 %2057, %v1008_v16   ;;  %939 = vrot.lane.b32.xlu1 %v915_v38, %s2211_s6  ;;  %s2219_s6 = smov 124  }
 0x1c7   :  { %v710_v13 = vpop.permute.xlu2 %709 }
 0x1c8   :  { %v740_v57 = vadd.f32 %v710_v13, %v620_v14  ;;  %v1003_v14 = vld [vmem:[%s3005_s3 + $0x90] sm:$0xff] }
 0x1ce   :  { %v826_v23 = vpop.permute.xlu0 %825 }
 0x1cf   :  { %v2726_v24 = vadd.f32 %v826_v23, %v738_v59  ;;  %v712_v32 = vpop.permute.xlu2 %711  ;;  %v623_v59 = vmul.f32 %v2560_v51, %v2653_v3  ;;  %v1001_v51 = vld [vmem:[%s3005_s3 + $0x50] sm:$0xff] }
 0x1d0   :  { %v741_v2 = vadd.f32 %v712_v32, %v2639_v17  ;;  %v625_v17 = vmul.f32 %v2569_v18, %v2671_v8  ;;  %v1002_v3 = vld [vmem:[%s3005_s3 + $0x70] sm:$0xff]  ;;  %1023 = vperm.xlu1 %2059, %v1001_v51  }
 0x1d1   :  { %1028 = vperm.xlu2 %2058, %v1002_v3  }
 0x1d6   :  { %v948_v15 = vpop.permute.xlu1 %947  ;;  %v828_v11 = vpop.permute.xlu0 %827 }
 0x1d7   :  { %v859_v58 = vadd.f32 %v828_v11, %v739_v10  ;;  %v714_v36 = vpop.permute.xlu2 %713 }
 0x1d8   :  { %v742_v23 = vadd.f32 %v714_v36, %v622_v7  ;;  %1033 = vperm.xlu1 %2059, %v1003_v14   ;;  %v995_v36 = vld [vmem:[#allocation2 + $0x40] sm:$0xff] }
 0x1d9   :  { %v2730_v26 = vadd.f32 %v948_v15, %v859_v58 }
 0x1de   :  { %v950_v27 = vpop.permute.xlu1 %949  ;;  %v830_v30 = vpop.permute.xlu0 %829 }
 0x1df   :  { %v860_v5 = vadd.f32 %v830_v30, %v740_v57  ;;  %v716_v35 = vpop.permute.xlu2 %715  ;;  %v1004_v57 = vld [vmem:[%s3005_s3 + $0xb0] sm:$0xff] }
 0x1e0   :  { %v743_v8 = vadd.f32 %v716_v35, %v623_v59  ;;  %1038 = vperm.xlu2 %2058, %v1004_v57   ;;  %v989_v35 = vld [vmem:[#allocation2 + $0x10] sm:$0xff] }
 0x1e1   :  { %v2734_v12 = vadd.f32 %v950_v27, %v860_v5  ;;  %v616_v27 = vmul.f32 %v2553_v31, %v2607_v25  ;;  %v1006_v25 = vld [vmem:[%s3005_s3 + $0xf0] sm:$0xff] }
 0x1e2   :  { %1048 = vperm.xlu1 %2059, %v1006_v25  }
 0x1e6   :  { %v952_v45 = vpop.permute.xlu1 %951  ;;  %v832_v20 = vpop.permute.xlu0 %831 }
 0x1e7   :  { %v861_v46 = vadd.f32 %v832_v20, %v741_v2  ;;  %v718_v42 = vpop.permute.xlu2 %717 }
 0x1e8   :  { %v744_v61 = vadd.f32 %v718_v42, %v2666_v34  ;;  %v998_v42 = vld [vmem:[#allocation2 + $0x58] sm:$0xff] }
 0x1e9   :  { %v981_v50 = vadd.f32 %v952_v45, %v861_v46 }
 0x1ee   :  { %v954_v40 = vpop.permute.xlu1 %953  ;;  %v834_v1 = vpop.permute.xlu0 %833 }
 0x1ef   :  { %v720_v49 = vpop.permute.xlu2 %719  ;;  %v862_v34 = vadd.f32 %v834_v1, %v742_v23  ;;  %v987_v1 = vld [vmem:[#allocation2] sm:$0xff] }
 0x1f0   :  { %v745_v55 = vadd.f32 %v720_v49, %v625_v17  ;;  %v993_v49 = vld [vmem:[#allocation2 + $0x30] sm:$0xff]  ;;  %v1236_v17 = vld [vmem:[#allocation4 + $0x68] sm:$0xff] }
 0x1f1   :  { %v982_v58 = vadd.f32 %v954_v40, %v862_v34 }
 0x1f6   :  { %v956_v33 = vpop.permute.xlu1 %955  ;;  %v836_v29 = vpop.permute.xlu0 %835 }
 0x1f7   :  { %v702_v38 = vpop.permute.xlu2 %701  ;;  %v863_v28 = vadd.f32 %v836_v29, %v743_v8  ;;  %v988_v29 = vld [vmem:[#allocation2 + $0x8] sm:$0xff] }
 0x1f8   :  { %v736_v5 = vadd.f32 %v702_v38, %v616_v27 }
 0x1f9   :  { %v983_v54 = vadd.f32 %v956_v33, %v863_v28  ;;  %v1010_v33 = vld [vmem:[%s3005_s3 + $0x170] sm:$0xff] }
 0x1fe   :  { %v958_v43 = vpop.permute.xlu1 %957  ;;  %v838_v44 = vpop.permute.xlu0 %837 }
 0x1ff   :  { %v864_v39 = vadd.f32 %v838_v44, %v744_v61  ;;  %v700_v13 = vpop.permute.xlu2 %699  ;;  %v990_v44 = vld [vmem:[#allocation2 + $0x18] sm:$0xff] }
 0x201   :  { %v984_v63 = vadd.f32 %v958_v43, %v864_v39  ;;  %v996_v43 = vld [vmem:[#allocation2 + $0x48] sm:$0xff] }
 0x206   :  { %v960_v62 = vpop.permute.xlu1 %959  ;;  %v840_v48 = vpop.permute.xlu0 %839 }
 0x207   :  { %v865_v37 = vadd.f32 %v840_v48, %v745_v55  ;;  %v820_v31 = vpop.permute.xlu2 %819  ;;  %v992_v48 = vld [vmem:[#allocation2 + $0x28] sm:$0xff] }
 0x208   :  { %v1233_v55 = vld [vmem:[#allocation4 + $0x8] sm:$0xff] }
 0x209   :  { %v985_v10 = vadd.f32 %v960_v62, %v865_v37  ;;  %v997_v62 = vld [vmem:[#allocation2 + $0x50] sm:$0xff] }
 0x20e   :  { %v722_v47 = vpop.permute.xlu1 %721  ;;  %v824_v56 = vpop.permute.xlu0 %823 }
 0x20f   :  { %v746_v4 = vadd.f32 %v722_v47, %v626_v21  ;;  %v857_v32 = vadd.f32 %v824_v56, %v2707_v19  ;;  %v1007_v19 = vld [vmem:[%s3005_s3 + $0x110] sm:$0xff]  ;;  %v991_v47 = vld [vmem:[#allocation2 + $0x20] sm:$0xff]  ;;  %v1235_v21 = vld [vmem:[#allocation4 + $0x48] sm:$0xff] }
 0x210   :  { %1053 = vperm.xlu2 %2058, %v1007_v19  }
 0x216   :  { %v842_v52 = vpop.permute.xlu1 %841  ;;  %v822_v15 = vpop.permute.xlu0 %821 }
 0x217   :  { %v866_v16 = vadd.f32 %v842_v52, %v746_v4  ;;  %v856_v20 = vadd.f32 %v822_v15, %v736_v5  ;;  %v994_v52 = vld [vmem:[#allocation2 + $0x38] sm:$0xff]  ;;  %v1014_v4 = vpop.permute.xlu2 %1013 }
 0x218   :  { %1068 = vperm.xlu2 %2058, %v1010_v33  }
 0x21e   :  { %v962_v18 = vpop.permute.xlu1 %961  ;;  %v942_v45 = vpop.permute.xlu0 %941 }
 0x21f   :  { %v986_v41 = vadd.f32 %v962_v18, %v866_v16 }
 0x220   :  { %2066 = vset.pattern.permute.xlu2 %v2215_v9 }
 0x221   :  { %1112 = vmatpush.msrb.mxu1 %v986_v41  ;;  %2012 = vmatpush.msra.mxu3 %v986_v41 }
 0x223   :  { %1113 = vmatpush.msrb.mxu1 %v985_v10  ;;  %2013 = vmatpush.msra.mxu3 %v985_v10 }
 0x225   :  { %1114 = vmatpush.msrb.mxu1 %v984_v63  ;;  %2014 = vmatpush.msra.mxu3 %v984_v63 }
 0x226   :  { %v946_v11 = vpop.permute.xlu1 %945  ;;  %v1019_v16 = vpop.permute.xlu0 %1018 }
 0x227   :  { %1115 = vmatpush.msrb.mxu1 %v983_v54  ;;  %2015 = vmatpush.msra.mxu3 %v983_v54  ;;  %v978_v2 = vadd.f32 %v946_v11, %v2726_v24  ;;  %v735_v24 = vadd.f32 %v700_v13, %v2605_v22  ;;  %v1009_v22 = vld [vmem:[%s3005_s3 + $0x150] sm:$0xff] }
 0x228   :  { %1063 = vperm.xlu1 %2059, %v1009_v22  }
 0x229   :  { %1116 = vmatpush.msrb.mxu1 %v982_v58  ;;  %2016 = vmatpush.msra.mxu3 %v982_v58 }
 0x22b   :  { %1117 = vmatpush.msrb.mxu1 %v981_v50  ;;  %2017 = vmatpush.msra.mxu3 %v981_v50  ;;  %v1029_v15 = vpop.permute.xlu2 %1028 }
 0x22d   :  { %1118 = vmatpush.msrb.mxu1 %v2734_v12  ;;  %2018 = vmatpush.msra.mxu3 %v2734_v12  ;;  %v976_v12 = vadd.f32 %v942_v45, %v856_v20 }
 0x22e   :  { %v944_v30 = vpop.permute.xlu1 %943  ;;  %v1044_v33 = vpop.permute.xlu0 %1043 }
 0x22f   :  { %1119 = vmatpush.msrb.mxu1 %v2730_v26  ;;  %2019 = vmatpush.msra.mxu3 %v2730_v26  ;;  %v977_v46 = vadd.f32 %v944_v30, %v857_v32  ;;  %v855_v26 = vadd.f32 %v820_v31, %v735_v24 }
 0x230   :  { %2061 = vset.pattern.permute.xlu1 %v2214_v6 }
 0x231   :  { %1120 = vmatpush.msrb.mxu1 %v978_v2  ;;  %2020 = vmatpush.msra.mxu3 %v978_v2 }
 0x233   :  { %1121 = vmatpush.msrb.mxu1 %v977_v46  ;;  %2021 = vmatpush.msra.mxu3 %v977_v46 }
 0x235   :  { %1122 = vmatpush.msrb.mxu1 %v976_v12  ;;  %2022 = vmatpush.msra.mxu3 %v976_v12 }
 0x236   :  { %v940_v50 = vpop.permute.xlu1 %939 }
 0x237   :  { %v975_v40 = vadd.f32 %v940_v50, %v855_v26 }
 0x239   :  { %1123 = vmatpush.msrb.mxu1 %v975_v40  ;;  %2023 = vmatpush.msra.mxu3 %v975_v40 }
 0x23a   :  { %1939 = vmatmul.msk.f32.vlgmr.msrb.gmra.mxu1 %vm1071_vm12, %v987_v1  ;;  %1947 = vmatmul.msk.f32.vlgmr.msra.gmra.mxu3 %vm1071_vm12, %v995_v36  ;;  %v1039_v19 = vpop.permute.xlu2 %1038 }
 0x23b   :  { %1286 = vmatpush.msrb.mxu3 %v1236_v17 }
 0x23d   :  { %1287 = vmatpush.msrb.mxu3 %v1235_v21 }
 0x23f   :  { %1288 = vmatpush.msrb.mxu3 %v1234_v53 }
 0x241   :  { %1289 = vmatpush.msrb.mxu3 %v1233_v55 }
 0x242   :  { %1940 = vmatmul.msk.f32.gmra.mxu1 %vm1071_vm12, %v988_v29  ;;  %1948 = vmatmul.msk.f32.gmra.mxu3 %vm1071_vm12, %v996_v43  ;;  %v1024_v23 = vpop.permute.xlu1 %1023 }
 0x24a   :  { %1941 = vmatmul.msk.f32.gmra.mxu1 %vm1071_vm12, %v989_v35  ;;  %1949 = vmatmul.msk.f32.gmra.mxu3 %vm1071_vm12, %v997_v62  ;;  %v1034_v5 = vpop.permute.xlu1 %1033 }
 0x252   :  { %1942 = vmatmul.msk.f32.gmra.mxu1 %vm1071_vm12, %v990_v44  ;;  %1950 = vmatmul.msk.f32.gmra.mxu3 %vm1071_vm12, %v998_v42 }
 0x25a   :  { %1943 = vmatmul.msk.f32.gmra.mxu1 %vm1071_vm12, %v991_v47 }
 0x262   :  { %1944 = vmatmul.msk.f32.gmra.mxu1 %vm1071_vm12, %v992_v48 }
 0x26a   :  { %1945 = vmatmul.msk.f32.gmra.mxu1 %vm1071_vm12, %v993_v49  ;;  %v1054_v47 = vpop.permute.xlu2 %1053 }
 0x272   :  { %1946 = vmatmul.msk.f32.gmra.mxu1 %vm1071_vm12, %v994_v52  ;;  %v1049_v52 = vpop.permute.xlu1 %1048 }
 0x2b7   :  { %v1125_v56 = vpop.f32.mrf.mxu1 }
 0x2b8   :  { %v1126_v59 = vadd.f32 %v1125_v56, %v1014_v4 }
 0x2ba   :  { %v1173_v61 = vmin.f32 %v1126_v59, 0.0  ;;  %vm1161_vm14 = vcmp.gt.f32.partialorder %v1126_v59, 0.0 }
 0x2bc   :  { %v1185_v37 = vmul.f32 1.442695, %v1173_v61 }
 0x2bd   :  { %v1149_v36 = vpop.f32.mrf.mxu3 }
 0x2be   :  { %2126 = vpow2.f32 %v1185_v37  ;;  %v1150_v49 = vadd.f32 %v1149_v36, %v1054_v47  ;;  %v1059_v37 = vpop.permute.xlu0 %1058 }
 0x2bf   :  { %v1128_v38 = vpop.f32.mrf.mxu1 }
 0x2c0   :  { %v1129_v18 = vadd.f32 %v1128_v38, %v1019_v16  ;;  %v1181_v4 = vmin.f32 %v1150_v49, 0.0  ;;  %vm1169_vm6 = vcmp.gt.f32.partialorder %v1150_v49, 0.0 }
 0x2c2   :  { %v1174_v7 = vmin.f32 %v1129_v18, 0.0  ;;  %vm1162_vm15 = vcmp.gt.f32.partialorder %v1129_v18, 0.0  ;;  %v1201_v38 = vmul.f32 1.442695, %v1181_v4 }
 0x2c4   :  { %v2127_v8 = vpop.eup %2126  ;;  %v1187_v39 = vmul.f32 1.442695, %v1174_v7 }
 0x2c5   :  { %v1951_v41 = vadd.f32 -1.0, %v2127_v8  ;;  %v1152_v17 = vpop.f32.mrf.mxu3 }
 0x2c6   :  { %2128 = vpow2.f32 %v1187_v39 }
 0x2c7   :  { %v1131_v28 = vpop.f32.mrf.mxu1  ;;  %v1221_v10 = vsel %vm1161_vm14, %v1126_v59, %v1951_v41  ;;  %v1064_v41 = vpop.permute.xlu1 %1063 }
 0x2c8   :  { %v1132_v51 = vadd.f32 %v1131_v28, %v1024_v23  ;;  %1963 = vmatmul.msk.f32.vlgmr.msrb.gmra.mxu3 %vm1237_vm13, %v1221_v10 }
 0x2ca   :  { %v1175_v3 = vmin.f32 %v1132_v51, 0.0  ;;  %vm1163_vm0 = vcmp.gt.f32.partialorder %v1132_v51, 0.0 }
 0x2cc   :  { %v2129_v34 = vpop.eup %2128  ;;  %v1189_v63 = vmul.f32 1.442695, %v1175_v3 }
 0x2cd   :  { %v1952_v54 = vadd.f32 -1.0, %v2129_v34  ;;  %v1155_v8 = vpop.f32.mrf.mxu3 }
 0x2ce   :  { %2130 = vpow2.f32 %v1189_v63 }
 0x2cf   :  { %v1134_v11 = vpop.f32.mrf.mxu1  ;;  %v1222_v58 = vsel %vm1162_vm15, %v1129_v18, %v1952_v54  ;;  %v1153_v18 = vadd.f32 %v1152_v17, %v1059_v37 }
 0x2d0   :  { %v1135_v13 = vadd.f32 %v1134_v11, %v1029_v15  ;;  %1964 = vmatmul.msk.f32.gmra.mxu3 %vm1237_vm13, %v1222_v58  ;;  %v1069_v11 = vpop.permute.xlu2 %1068 }
 0x2d1   :  { %v1182_v39 = vmin.f32 %v1153_v18, 0.0  ;;  %vm1170_vm7 = vcmp.gt.f32.partialorder %v1153_v18, 0.0 }
 0x2d2   :  { %v1176_v14 = vmin.f32 %v1135_v13, 0.0  ;;  %vm1164_vm1 = vcmp.gt.f32.partialorder %v1135_v13, 0.0 }
 0x2d3   :  { %v1203_v10 = vmul.f32 1.442695, %v1182_v39 }
 0x2d4   :  { %v2131_v57 = vpop.eup %2130  ;;  %v1191_v27 = vmul.f32 1.442695, %v1176_v14 }
 0x2d5   :  { %v1953_v30 = vadd.f32 -1.0, %v2131_v57  ;;  %v1158_v54 = vpop.f32.mrf.mxu3 }
 0x2d6   :  { %2132 = vpow2.f32 %v1191_v27 }
 0x2d7   :  { %v1137_v32 = vpop.f32.mrf.mxu1  ;;  %v1223_v2 = vsel %vm1163_vm0, %v1132_v51, %v1953_v30  ;;  %v1156_v51 = vadd.f32 %v1155_v8, %v1064_v41  ;;  %v1330_v41 = vld [vmem:[%s3005_s3 + $0x78] sm:$0xff] }
 0x2d8   :  { %v1138_v45 = vadd.f32 %v1137_v32, %v1034_v5  ;;  %1965 = vmatmul.msk.f32.gmra.mxu3 %vm1237_vm13, %v1223_v2 }
 0x2d9   :  { %v1183_v63 = vmin.f32 %v1156_v51, 0.0  ;;  %vm1171_vm8 = vcmp.gt.f32.partialorder %v1156_v51, 0.0 }
 0x2da   :  { %v1177_v20 = vmin.f32 %v1138_v45, 0.0  ;;  %vm1165_vm2 = vcmp.gt.f32.partialorder %v1138_v45, 0.0 }
 0x2db   :  { %v1205_v58 = vmul.f32 1.442695, %v1183_v63 }
 0x2dc   :  { %v2133_v46 = vpop.eup %2132  ;;  %v1193_v31 = vmul.f32 1.442695, %v1177_v20 }
 0x2dd   :  { %v1954_v25 = vadd.f32 -1.0, %v2133_v46 }
 0x2de   :  { %2134 = vpow2.f32 %v1193_v31 }
 0x2df   :  { %v1140_v24 = vpop.f32.mrf.mxu1  ;;  %v1224_v12 = vsel %vm1164_vm1, %v1135_v13, %v1954_v25  ;;  %v1159_v13 = vadd.f32 %v1158_v54, %v1069_v11 }
 0x2e0   :  { %v1141_v26 = vadd.f32 %v1140_v24, %v1039_v19  ;;  %1966 = vmatmul.msk.f32.gmra.mxu3 %vm1237_vm13, %v1224_v12 }
 0x2e1   :  { %v1184_v27 = vmin.f32 %v1159_v13, 0.0  ;;  %vm1172_vm9 = vcmp.gt.f32.partialorder %v1159_v13, 0.0 }
 0x2e2   :  { %v1178_v50 = vmin.f32 %v1141_v26, 0.0  ;;  %vm1166_vm3 = vcmp.gt.f32.partialorder %v1141_v26, 0.0 }
 0x2e3   :  { %v1207_v5 = vmul.f32 1.442695, %v1184_v27 }
 0x2e4   :  { %v2135_v40 = vpop.eup %2134  ;;  %v1195_v1 = vmul.f32 1.442695, %v1178_v50 }
 0x2e5   :  { %v1955_v22 = vadd.f32 -1.0, %v2135_v40 }
 0x2e6   :  { %2136 = vpow2.f32 %v1195_v1 }
 0x2e7   :  { %v1143_v29 = vpop.f32.mrf.mxu1  ;;  %v1225_v43 = vsel %vm1165_vm2, %v1138_v45, %v1955_v22 }
 0x2e8   :  { %v1144_v35 = vadd.f32 %v1143_v29, %v1044_v33  ;;  %1967 = vmatmul.msk.f32.gmra.mxu3 %vm1237_vm13, %v1225_v43 }
 0x2ea   :  { %v1179_v62 = vmin.f32 %v1144_v35, 0.0  ;;  %vm1167_vm4 = vcmp.gt.f32.partialorder %v1144_v35, 0.0 }
 0x2ec   :  { %v2137_v44 = vpop.eup %2136  ;;  %v1197_v42 = vmul.f32 1.442695, %v1179_v62 }
 0x2ed   :  { %v1956_v48 = vadd.f32 -1.0, %v2137_v44 }
 0x2ee   :  { %2138 = vpow2.f32 %v1197_v42  ;;  %v2849_v42 = vld [vmem:[%s3005_s3 + $0x18] sm:$0xff] }
 0x2ef   :  { %v1146_v21 = vpop.f32.mrf.mxu1  ;;  %v1226_v53 = vsel %vm1166_vm3, %v1141_v26, %v1956_v48 }
 0x2f0   :  { %v1147_v55 = vadd.f32 %v1146_v21, %v1049_v52  ;;  %1968 = vmatmul.msk.f32.gmra.mxu3 %vm1237_vm13, %v1226_v53  ;;  %v2865_v53 = vld [vmem:[%s3005_s3 + $0x38] sm:$0xff] }
 0x2f2   :  { %v1180_v56 = vmin.f32 %v1147_v55, 0.0  ;;  %vm1168_vm5 = vcmp.gt.f32.partialorder %v1147_v55, 0.0 }
 0x2f4   :  { %v2139_v59 = vpop.eup %2138  ;;  %v1199_v61 = vmul.f32 1.442695, %v1180_v56 }
 0x2f5   :  { %v1957_v16 = vadd.f32 -1.0, %v2139_v59 }
 0x2f6   :  { %2140 = vpow2.f32 %v1199_v61 }
 0x2f7   :  { %v1227_v7 = vsel %vm1167_vm4, %v1144_v35, %v1957_v16  ;;  %2142 = vpow2.f32 %v1201_v38  ;;  %v1329_v35 = vld [vmem:[%s3005_s3 + $0x58] sm:$0xff] }
 0x2f8   :  { %1969 = vmatmul.msk.f32.gmra.mxu3 %vm1237_vm13, %v1227_v7  ;;  %2144 = vpow2.f32 %v1203_v10 }
 0x2f9   :  { %2146 = vpow2.f32 %v1205_v58 }
 0x2fa   :  { %2148 = vpow2.f32 %v1207_v5 }
 0x2fc   :  { %v2141_v23 = vpop.eup %2140 }
 0x2fd   :  { %v1958_v28 = vadd.f32 -1.0, %v2141_v23  ;;  %v2143_v34 = vpop.eup %2142 }
 0x2fe   :  { %v1959_v15 = vadd.f32 -1.0, %v2143_v34  ;;  %v2145_v57 = vpop.eup %2144  ;;  %v1332_v34 = vld [vmem:[%s3005_s3 + $0xb8] sm:$0xff] }
 0x2ff   :  { %v1228_v3 = vsel %vm1168_vm5, %v1147_v55, %v1958_v28  ;;  %v1960_v30 = vadd.f32 -1.0, %v2145_v57  ;;  %v2147_v2 = vpop.eup %2146 }
 0x300   :  { %1970 = vmatmul.msk.f32.gmra.mxu3 %vm1237_vm13, %v1228_v3  ;;  %v1229_v14 = vsel %vm1169_vm6, %v1150_v49, %v1959_v15  ;;  %v1961_v45 = vadd.f32 -1.0, %v2147_v2  ;;  %v2149_v46 = vpop.eup %2148  ;;  %v1333_v2 = vld [vmem:[%s3005_s3 + $0xd8] sm:$0xff] }
 0x301   :  { %v1230_v32 = vsel %vm1170_vm7, %v1153_v18, %v1960_v30  ;;  %v1962_v31 = vadd.f32 -1.0, %v2149_v46 }
 0x302   :  { %v1231_v20 = vsel %vm1171_vm8, %v1156_v51, %v1961_v45 }
 0x303   :  { %v1232_v25 = vsel %vm1172_vm9, %v1159_v13, %v1962_v31 }
 0x308   :  { %1971 = vmatmul.msk.f32.gmra.mxu3 %vm1237_vm13, %v1229_v14 }
 0x310   :  { %1972 = vmatmul.msk.f32.gmra.mxu3 %vm1237_vm13, %v1230_v32 }
 0x318   :  { %1973 = vmatmul.msk.f32.gmra.mxu3 %vm1237_vm13, %v1231_v20 }
 0x320   :  { %1974 = vmatmul.msk.f32.gmra.mxu3 %vm1237_vm13, %v1232_v25 }
 0x34b   :  { %v1291_v19 = vpop.f32.mrf.mxu3 }
 0x34c   :  { %1532 = vperm.xlu1 %2061, %v1291_v19   ;;  %1341 = vperm.xlu0 %2057, %v1291_v19  }
 0x353   :  { %v1294_v24 = vpop.f32.mrf.mxu3 }
 0x354   :  { %2063 = vset.pattern.permute.xlu1 %v2212_v0  ;;  %2060 = vset.pattern.permute.xlu0 %v2213_v60 }
 0x355   :  { %1656 = vperm.xlu2 %2066, %v1294_v24   ;;  %1412 = vperm.xlu0 %2060, %v1291_v19  }
 0x356   :  { %1346 = vperm.xlu1 %2063, %v1294_v24  }
 0x35b   :  { %v1297_v12 = vpop.f32.mrf.mxu3 }
 0x35d   :  { %2067 = vset.pattern.permute.xlu2 %v2212_v0  ;;  %2062 = vset.pattern.permute.xlu0 %v2215_v9 }
 0x35e   :  { %2064 = vset.pattern.permute.xlu1 %v2213_v60  ;;  %1351 = vperm.xlu2 %2067, %v1297_v12  }
 0x35f   :  { %1652 = vperm.xlu0 %2062, %v1291_v19   ;;  %1416 = vperm.xlu1 %2064, %v1294_v24  }
 0x363   :  { %v1300_v26 = vpop.f32.mrf.mxu3 }
 0x366   :  { %2069 = vset.pattern.permute.xlu2 %v2214_v6 }
 0x367   :  { %2068 = vset.pattern.permute.xlu0 %v2213_v60  ;;  %2065 = vset.pattern.permute.xlu1 %v2214_v6 }
 0x368   :  { %1540 = vperm.xlu2 %2069, %v1297_v12   ;;  %1536 = vperm.xlu1 %2065, %v1294_v24  }
 0x369   :  { %1420 = vperm.xlu0 %2068, %v1297_v12  }
 0x36b   :  { %v1303_v50 = vpop.f32.mrf.mxu3 }
 0x370   :  { %2070 = vset.pattern.permute.xlu2 %v2215_v9  ;;  %1544 = vperm.xlu1 %2065, %v1300_v26  }
 0x371   :  { %2071 = vset.pattern.permute.xlu0 %v2212_v0  ;;  %1660 = vperm.xlu2 %2070, %v1297_v12  }
 0x372   :  { %1356 = vperm.xlu0 %2071, %v1300_v26  }
 0x373   :  { %v1306_v40 = vpop.f32.mrf.mxu3 }
 0x378   :  { %2074 = vset.pattern.permute.xlu1 %v2212_v0 }
 0x379   :  { %2072 = vset.pattern.permute.xlu2 %v2213_v60  ;;  %1361 = vperm.xlu1 %2074, %v1303_v50  }
 0x37a   :  { %1424 = vperm.xlu2 %2072, %v1300_v26   ;;  %2073 = vset.pattern.permute.xlu0 %v2215_v9 }
 0x37b   :  { %1664 = vperm.xlu0 %2073, %v1300_v26   ;;  %v1309_v1 = vpop.f32.mrf.mxu3 }
 0x381   :  { %2075 = vset.pattern.permute.xlu1 %v2214_v6 }
 0x382   :  { %1428 = vperm.xlu2 %2072, %v1303_v50   ;;  %1548 = vperm.xlu1 %2075, %v1303_v50  }
 0x383   :  { %2079 = vset.pattern.permute.xlu0 %v2214_v6  ;;  %v1312_v36 = vpop.f32.mrf.mxu3 }
 0x384   :  { %1552 = vperm.xlu0 %2079, %v1306_v40  }
 0x38a   :  { %2076 = vset.pattern.permute.xlu2 %v2215_v9  ;;  %2078 = vset.pattern.permute.xlu1 %v2213_v60 }
 0x38b   :  { %1668 = vperm.xlu2 %2076, %v1303_v50   ;;  %1432 = vperm.xlu1 %2078, %v1306_v40   ;;  %v1315_v22 = vpop.f32.mrf.mxu3 }
 0x38c   :  { %2081 = vset.pattern.permute.xlu0 %v2212_v0 }
 0x38d   :  { %1371 = vperm.xlu0 %2081, %v1309_v1  }
 0x393   :  { %2077 = vset.pattern.permute.xlu2 %v2212_v0  ;;  %1436 = vperm.xlu1 %2078, %v1309_v1   ;;  %v1318_v33 = vpop.f32.mrf.mxu3 }
 0x394   :  { %1366 = vperm.xlu2 %2077, %v1306_v40  }
 0x395   :  { %2085 = vset.pattern.permute.xlu0 %v2213_v60 }
 0x396   :  { %1440 = vperm.xlu0 %2085, %v1312_v36  }
 0x39b   :  { %2083 = vset.pattern.permute.xlu1 %v2215_v9  ;;  %v1321_v43 = vpop.f32.mrf.mxu3 }
 0x39c   :  { %2080 = vset.pattern.permute.xlu2 %v2215_v9  ;;  %1676 = vperm.xlu1 %2083, %v1309_v1  }
 0x39d   :  { %1672 = vperm.xlu2 %2080, %v1306_v40   ;;  %v1334_v40 = vld [vmem:[%s3005_s3 + $0xf8] sm:$0xff] }
 0x39e   :  { %2090 = vset.pattern.permute.xlu0 %v2215_v9 }
 0x39f   :  { %1684 = vperm.xlu0 %2090, %v1315_v22  }
 0x3a3   :  { %v1324_v61 = vpop.f32.mrf.mxu3 }
 0x3a4   :  { %2084 = vset.pattern.permute.xlu1 %v2212_v0 }
 0x3a5   :  { %2082 = vset.pattern.permute.xlu2 %v2214_v6  ;;  %1376 = vperm.xlu1 %2084, %v1312_v36  }
 0x3a6   :  { %1556 = vperm.xlu2 %2082, %v1309_v1  }
 0x3a7   :  { %2091 = vset.pattern.permute.xlu0 %v2212_v0 }
 0x3a8   :  { %1386 = vperm.xlu0 %2091, %v1318_v33  }
 0x3ad   :  { %2086 = vset.pattern.permute.xlu1 %v2215_v9 }
 0x3ae   :  { %1560 = vperm.xlu2 %2082, %v1312_v36   ;;  %1680 = vperm.xlu1 %2086, %v1312_v36  }
 0x3af   :  { %v2835_v29 = vpop.permute.xlu2 %1656 }
 0x3b0   :  { %2095 = vset.pattern.permute.xlu0 %v2214_v6 }
 0x3b1   :  { %1572 = vperm.xlu0 %2095, %v1321_v43  }
 0x3b6   :  { %2087 = vset.pattern.permute.xlu2 %v2212_v0  ;;  %2089 = vset.pattern.permute.xlu1 %v2214_v6 }
 0x3b7   :  { %1381 = vperm.xlu2 %2087, %v1315_v22   ;;  %1564 = vperm.xlu1 %2089, %v1315_v22  }
 0x3b8   :  { %v1352_v62 = vpop.permute.xlu2 %1351 }
 0x3b9   :  { %v2843_v44 = vmul.f32 %v1352_v62, %v1329_v35  ;;  %2101 = vset.pattern.permute.xlu0 %v2215_v9 }
 0x3be   :  { %v2851_v47 = vpop.permute.xlu1 %1532  ;;  %v1342_v48 = vpop.permute.xlu0 %1341 }
 0x3bf   :  { %2088 = vset.pattern.permute.xlu2 %v2213_v60  ;;  %v2855_v49 = vmul.f32 %v1342_v48, %v2849_v42  ;;  %1568 = vperm.xlu1 %2089, %v1318_v33  }
 0x3c0   :  { %1444 = vperm.xlu2 %2088, %v1315_v22   ;;  %v1335_v22 = vld [vmem:[%s3005_s3 + $0x118] sm:$0xff] }
 0x3c2   :  { %v1541_v52 = vpop.permute.xlu2 %1540 }
 0x3c3   :  { %v2857_v17 = vmul.f32 %v1541_v52, %v1329_v35 }
 0x3c7   :  { %2093 = vset.pattern.permute.xlu1 %v2212_v0  ;;  %v2860_v21 = vpop.permute.xlu0 %1412 }
 0x3c8   :  { %1448 = vperm.xlu2 %2088, %v1318_v33   ;;  %v1347_v55 = vpop.permute.xlu1 %1346  ;;  %1391 = vperm.xlu1 %2093, %v1321_v43  }
 0x3c9   :  { %v2868_v4 = vmul.f32 %v1347_v55, %v2865_v53 }
 0x3cb   :  { %v1661_v56 = vpop.permute.xlu2 %1660 }
 0x3cc   :  { %v2870_v59 = vmul.f32 %v1661_v56, %v1329_v35  ;;  %v1336_v56 = vld [vmem:[%s3005_s3 + $0x138] sm:$0xff] }
 0x3d0   :  { %2092 = vset.pattern.permute.xlu2 %v2215_v9  ;;  %2098 = vset.pattern.permute.xlu1 %v2213_v60 }
 0x3d1   :  { %1688 = vperm.xlu2 %2092, %v1318_v33   ;;  %v2874_v37 = vpop.permute.xlu0 %1652  ;;  %v2876_v16 = vpop.permute.xlu1 %1416  ;;  %1456 = vperm.xlu1 %2098, %v1324_v61  }
 0x3d4   :  { %v1425_v38 = vpop.permute.xlu2 %1424 }
 0x3d5   :  { %v1462_v58 = vmul.f32 %v1425_v38, %v1330_v41 }
 0x3d9   :  { %2094 = vset.pattern.permute.xlu2 %v2213_v60  ;;  %2099 = vset.pattern.permute.xlu1 %v2214_v6  ;;  %v1331_v6 = vld [vmem:[%s3005_s3 + $0x98] sm:$0xff] }
 0x3da   :  { %1452 = vperm.xlu2 %2094, %v1321_v43   ;;  %v2880_v18 = vpop.permute.xlu1 %1536  ;;  %1576 = vperm.xlu1 %2099, %v1324_v61  }
 0x3db   :  { %v1421_v7 = vpop.permute.xlu0 %1420 }
 0x3dc   :  { %v1429_v8 = vpop.permute.xlu2 %1428  ;;  %v1461_v51 = vmul.f32 %v1421_v7, %v1329_v35 }
 0x3dd   :  { %v1463_v30 = vmul.f32 %v1429_v8, %v1331_v6 }
 0x3e2   :  { %2096 = vset.pattern.permute.xlu2 %v2215_v9  ;;  %v1545_v39 = vpop.permute.xlu1 %1544  ;;  %2100 = vset.pattern.permute.xlu1 %v2215_v9 }
 0x3e3   :  { %1692 = vperm.xlu2 %2096, %v1321_v43   ;;  %1696 = vperm.xlu1 %2100, %v1324_v61   ;;  %v1582_v13 = vmul.f32 %v1545_v39, %v1330_v41 }
 0x3e4   :  { %v1357_v60 = vpop.permute.xlu0 %1356 }
 0x3e5   :  { %v2890_v23 = vmul.f32 %v1357_v60, %v1330_v41  ;;  %v1669_v28 = vpop.permute.xlu2 %1668 }
 0x3e6   :  { %v1703_v10 = vmul.f32 %v1669_v28, %v1331_v6 }
 0x3e8   :  { %1731 = vrot.lane.b32.xlu0 %v1703_v10, %s2218_s4 }
 0x3eb   :  { %2097 = vset.pattern.permute.xlu2 %v2212_v0  ;;  %v1362_v9 = vpop.permute.xlu1 %1361  ;;  %1487 = vrot.lane.b32.xlu1 %v1461_v51, %s2219_s6 }
 0x3ec   :  { %v2895_v3 = vmul.f32 %v1362_v9, %v1331_v6  ;;  %1396 = vperm.xlu2 %2097, %v1324_v61  }
 0x3ed   :  { %v1665_v63 = vpop.permute.xlu0 %1664 }
 0x3ee   :  { %v2900_v54 = vmul.f32 %v1665_v63, %v1330_v41  ;;  %v1367_v15 = vpop.permute.xlu2 %1366 }
 0x3ef   :  { %v2902_v11 = vmul.f32 %v1367_v15, %v1332_v34 }
 0x3f3   :  { %1489 = vrot.lane.b32.xlu1 %v1462_v58, %s2219_s6 }
 0x3f4   :  { %1609 = vrot.lane.b32.xlu2 %v1582_v13, %s2220_s9  ;;  %v1549_v0 = vpop.permute.xlu1 %1548  ;;  %v1337_v13 = vld [vmem:[%s3005_s3 + $0x158] sm:$0xff] }
 0x3f5   :  { %v1583_v5 = vmul.f32 %v1549_v0, %v1331_v6 }
 0x3f6   :  { %v1553_v14 = vpop.permute.xlu0 %1552 }
 0x3f7   :  { %v1673_v57 = vpop.permute.xlu2 %1672  ;;  %v1584_v25 = vmul.f32 %v1553_v14, %v1332_v34 }
 0x3f8   :  { %v1704_v27 = vmul.f32 %v1673_v57, %v1332_v34 }
 0x3fa   :  { %1733 = vrot.lane.b32.xlu0 %v1704_v27, %s2218_s4 }
 0x3fb   :  { %1491 = vrot.lane.b32.xlu1 %v1463_v30, %s2219_s6 }
 0x3fc   :  { %1611 = vrot.lane.b32.xlu2 %v1583_v5, %s2220_s9 }
 0x3fd   :  { %v1433_v32 = vpop.permute.xlu1 %1432 }
 0x3fe   :  { %v1464_v31 = vmul.f32 %v1433_v32, %v1332_v34  ;;  %v1338_v32 = vld [vmem:[%s3005_s3 + $0x178] sm:$0xff] }
 0x3ff   :  { %v1372_v45 = vpop.permute.xlu0 %1371 }
 0x400   :  { %v2912_v20 = vmul.f32 %v1372_v45, %v1333_v2  ;;  %v1557_v46 = vpop.permute.xlu2 %1556 }
 0x401   :  { %v1585_v50 = vmul.f32 %v1557_v46, %v1333_v2 }
 0x403   :  { %1493 = vrot.lane.b32.xlu1 %v1464_v31, %s2219_s6 }
 0x404   :  { %1613 = vrot.lane.b32.xlu2 %v1584_v25, %s2220_s9 }
 0x405   :  { %v1437_v19 = vpop.permute.xlu1 %1436 }
 0x406   :  { %v1465_v26 = vmul.f32 %v1437_v19, %v1333_v2  ;;  %v1460_v19 = vmul.f32 %v2876_v16, %v2865_v53  ;;  %v1579_v16 = vmul.f32 %v2851_v47, %v2849_v42 }
 0x408   :  { %v1561_v24 = vpop.permute.xlu2 %1560  ;;  %v1441_v12 = vpop.permute.xlu0 %1440 }
 0x409   :  { %v1466_v33 = vmul.f32 %v1441_v12, %v1334_v40  ;;  %v1586_v62 = vmul.f32 %v1561_v24, %v1334_v40 }
 0x40b   :  { %1495 = vrot.lane.b32.xlu1 %v1465_v26, %s2219_s6  ;;  %v1580_v26 = vmul.f32 %v2880_v18, %v2865_v53 }
 0x40c   :  { %1615 = vrot.lane.b32.xlu2 %v1585_v50, %s2220_s9  ;;  %v1459_v50 = vmul.f32 %v2860_v21, %v2849_v42 }
 0x40e   :  { %v1677_v1 = vpop.permute.xlu1 %1676 }
 0x40f   :  { %v1705_v36 = vmul.f32 %v1677_v1, %v1333_v2 }
 0x411   :  { %v1685_v43 = vpop.permute.xlu0 %1684  ;;  %v1382_v35 = vpop.permute.xlu2 %1381  ;;  %1735 = vrot.lane.b32.xlu0 %v1705_v36, %s2218_s4 }
 0x412   :  { %v2925_v48 = vmul.f32 %v1382_v35, %v1335_v22  ;;  %v1707_v28 = vmul.f32 %v1685_v43, %v1335_v22 }
 0x413   :  { %1497 = vrot.lane.b32.xlu1 %v1466_v33, %s2219_s6 }
 0x414   :  { %1617 = vrot.lane.b32.xlu2 %v1586_v62, %s2220_s9 }
 0x417   :  { %v1377_v52 = vpop.permute.xlu1 %1376 }
 0x418   :  { %v2929_v55 = vmul.f32 %v1377_v52, %v1334_v40 }
 0x41a   :  { %v1445_v61 = vpop.permute.xlu2 %1444  ;;  %v1387_v38 = vpop.permute.xlu0 %1386 }
 0x41b   :  { %v1467_v7 = vmul.f32 %v1445_v61, %v1335_v22  ;;  %v2934_v8 = vmul.f32 %v1387_v38, %v1336_v56 }
 0x41d   :  { %1499 = vrot.lane.b32.xlu1 %v1467_v7, %s2219_s6 }
 0x420   :  { %v1681_v39 = vpop.permute.xlu1 %1680 }
 0x421   :  { %v1706_v41 = vmul.f32 %v1681_v39, %v1334_v40 }
 0x422   :  { %v1449_v60 = vpop.permute.xlu2 %1448 }
 0x423   :  { %v1468_v6 = vmul.f32 %v1449_v60, %v1336_v56  ;;  %1737 = vrot.lane.b32.xlu0 %v1706_v41, %s2218_s4  ;;  %v1573_v5 = vpop.permute.xlu0 %1572 }
 0x424   :  { %v1589_v2 = vmul.f32 %v1573_v5, %v1337_v13 }
 0x425   :  { %1501 = vrot.lane.b32.xlu1 %v1468_v6, %s2219_s6 }
 0x429   :  { %v1565_v10 = vpop.permute.xlu1 %1564 }
 0x42a   :  { %v1587_v51 = vmul.f32 %v1565_v10, %v1335_v22 }
 0x42b   :  { %v1689_v9 = vpop.permute.xlu2 %1688  ;;  %1739 = vrot.lane.b32.xlu0 %v1707_v28, %s2218_s4 }
 0x42c   :  { %1619 = vrot.lane.b32.xlu2 %v1587_v51, %s2220_s9  ;;  %v1708_v34 = vmul.f32 %v1689_v9, %v1336_v56 }
 0x431   :  { %v1569_v63 = vpop.permute.xlu1 %1568 }
 0x432   :  { %v1588_v15 = vmul.f32 %v1569_v63, %v1336_v56 }
 0x433   :  { %1741 = vrot.lane.b32.xlu0 %v1708_v34, %s2218_s4 }
 0x434   :  { %v1453_v58 = vpop.permute.xlu2 %1452  ;;  %1621 = vrot.lane.b32.xlu2 %v1588_v15, %s2220_s9 }
 0x435   :  { %v1469_v0 = vmul.f32 %v1453_v58, %v1337_v13 }
 0x43a   :  { %v1392_v14 = vpop.permute.xlu1 %1391 }
 0x43b   :  { %v2946_v57 = vmul.f32 %v1392_v14, %v1337_v13 }
 0x43c   :  { %1503 = vrot.lane.b32.xlu2 %v1469_v0, %s2219_s6 }
 0x43d   :  { %v1693_v27 = vpop.permute.xlu2 %1692 }
 0x43e   :  { %v1709_v30 = vmul.f32 %v1693_v27, %v1337_v13 }
 0x440   :  { %1743 = vrot.lane.b32.xlu0 %v1709_v30, %s2218_s4 }
 0x443   :  { %v1457_v45 = vpop.permute.xlu1 %1456 }
 0x444   :  { %v1470_v46 = vmul.f32 %v1457_v45, %v1338_v32  ;;  %1623 = vrot.lane.b32.xlu2 %v1589_v2, %s2220_s9 }
 0x446   :  { %v1397_v31 = vpop.permute.xlu2 %1396  ;;  %1505 = vrot.lane.b32.xlu1 %v1470_v46, %s2219_s6 }
 0x447   :  { %v1410_v25 = vmul.f32 %v1397_v31, %v1338_v32 }
 0x44c   :  { %v1577_v24 = vpop.permute.xlu1 %1576  ;;  %1607 = vrot.lane.b32.xlu2 %v2857_v17, %s2220_s9  ;;  %v1700_v17 = vmul.f32 %v2835_v29, %v2865_v53 }
 0x44d   :  { %v1590_v12 = vmul.f32 %v1577_v24, %v1338_v32 }
 0x44e   :  { %1485 = vrot.lane.b32.xlu1 %v1460_v19, %s2219_s6  ;;  %v1610_v21 = vpop.permute.xlu2 %1609 }
 0x44f   :  { %1625 = vrot.lane.b32.xlu0 %v1590_v12, %s2220_s9 }
 0x454   :  { %1605 = vrot.lane.b32.xlu2 %v1580_v26, %s2220_s9 }
 0x455   :  { %v1697_v40 = vpop.permute.xlu1 %1696 }
 0x456   :  { %v1710_v1 = vmul.f32 %v1697_v40, %v1338_v32  ;;  %1483 = vrot.lane.b32.xlu1 %v1459_v50, %s2219_s6  ;;  %v1612_v47 = vpop.permute.xlu2 %1611 }
 0x458   :  { %1745 = vrot.lane.b32.xlu0 %v1710_v1, %s2218_s4 }
 0x45c   :  { %1725 = vrot.lane.b32.xlu2 %v1700_v17, %s2218_s4 }
 0x45d   :  { %v1488_v18 = vpop.permute.xlu1 %1487 }
 0x45e   :  { %v2974_v36 = vadd.f32 %v1488_v18, %v2843_v44  ;;  %1603 = vrot.lane.b32.xlu1 %v1579_v16, %s2220_s9  ;;  %v1699_v44 = vmul.f32 %v2874_v37, %v2849_v42  ;;  %v1614_v56 = vpop.permute.xlu2 %1613 }
 0x460   :  { %1729 = vrot.lane.b32.xlu0 %v2900_v54, %s2218_s4  ;;  %v1732_v54 = vpop.permute.xlu0 %1731 }
 0x465   :  { %v1490_v22 = vpop.permute.xlu1 %1489 }
 0x466   :  { %v1522_v33 = vadd.f32 %v1490_v22, %v2890_v23  ;;  %v1616_v7 = vpop.permute.xlu2 %1615 }
 0x468   :  { %1727 = vrot.lane.b32.xlu0 %v2870_v59, %s2218_s4  ;;  %v2982_v29 = vadd.f32 %v1610_v21, %v1522_v33 }
 0x46c   :  { %v1734_v59 = vpop.permute.xlu0 %1733 }
 0x46d   :  { %v1492_v53 = vpop.permute.xlu1 %1491 }
 0x46e   :  { %v1523_v43 = vadd.f32 %v1492_v53, %v2895_v3  ;;  %v1618_v41 = vpop.permute.xlu2 %1617 }
 0x470   :  { %v1643_v35 = vadd.f32 %v1612_v47, %v1523_v43  ;;  %1723 = vrot.lane.b32.xlu0 %v1699_v44, %s2218_s4 }
 0x472   :  { %v1763_v62 = vadd.f32 %v1732_v54, %v1643_v35 }
 0x475   :  { %v1494_v52 = vpop.permute.xlu1 %1493 }
 0x476   :  { %v1524_v23 = vadd.f32 %v1494_v52, %v2902_v11  ;;  %v1771_v52 = vld [vmem:[#allocation4 + $0x10] sm:$0xf] }
 0x478   :  { %v1644_v61 = vadd.f32 %v1614_v56, %v1524_v23 }
 0x47a   :  { %v1764_v38 = vadd.f32 %v1734_v59, %v1644_v61 }
 0x47d   :  { %v1496_v60 = vpop.permute.xlu1 %1495 }
 0x47e   :  { %v1525_v12 = vadd.f32 %v1496_v60, %v2912_v20 }
 0x480   :  { %v1645_v40 = vadd.f32 %v1616_v7, %v1525_v12 }
 0x483   :  { %v1736_v39 = vpop.permute.xlu0 %1735 }
 0x484   :  { %v1765_v16 = vadd.f32 %v1736_v39, %v1645_v40 }
 0x485   :  { %v1498_v37 = vpop.permute.xlu1 %1497 }
 0x486   :  { %v1620_v42 = vpop.permute.xlu2 %1619  ;;  %v1526_v31 = vadd.f32 %v1498_v37, %v2929_v55 }
 0x48e   :  { %v1622_v28 = vpop.permute.xlu2 %1621 }
 0x48f   :  { %v1500_v10 = vpop.permute.xlu1 %1499 }
 0x490   :  { %v1527_v2 = vadd.f32 %v1500_v10, %v2925_v48 }
 0x495   :  { %v1738_v6 = vpop.permute.xlu0 %1737 }
 0x496   :  { %v1504_v9 = vpop.permute.xlu2 %1503 }
 0x497   :  { %v1502_v34 = vpop.permute.xlu1 %1501  ;;  %v1529_v14 = vadd.f32 %v1504_v9, %v2946_v57 }
 0x498   :  { %v1528_v0 = vadd.f32 %v1502_v34, %v2934_v8  ;;  %v1646_v8 = vadd.f32 %v1618_v41, %v1526_v31 }
 0x49a   :  { %v1648_v19 = vadd.f32 %v1622_v28, %v1528_v0  ;;  %v1766_v1 = vadd.f32 %v1738_v6, %v1646_v8 }
 0x49d   :  { %v1740_v3 = vpop.permute.xlu0 %1739 }
 0x49e   :  { %v1624_v15 = vpop.permute.xlu2 %1623 }
 0x49f   :  { %v1649_v45 = vadd.f32 %v1624_v15, %v1529_v14 }
 0x4a5   :  { %v1742_v51 = vpop.permute.xlu0 %1741 }
 0x4a6   :  { %v1608_v27 = vpop.permute.xlu2 %1607  ;;  %v1768_v26 = vadd.f32 %v1742_v51, %v1648_v19 }
 0x4a7   :  { %v1641_v20 = vadd.f32 %v1608_v27, %v2974_v36  ;;  %v1772_v36 = vld [vmem:[#allocation4 + $0x18] ss:$0 sm:$0xff] }
 0x4ae   :  { %v1606_v48 = vpop.permute.xlu2 %1605 }
 0x4b2   :  { %v1744_v63 = vpop.permute.xlu0 %1743 }
 0x4b3   :  { %v1769_v24 = vadd.f32 %v1744_v63, %v1649_v45 }
 0x4b6   :  { %v1726_v47 = vpop.permute.xlu2 %1725 }
 0x4b8   :  { %v1506_v11 = vpop.permute.xlu1 %1505 }
 0x4b9   :  { %v1530_v13 = vadd.f32 %v1506_v11, %v1410_v25  ;;  %v1647_v25 = vadd.f32 %v1620_v42, %v1527_v2 }
 0x4bb   :  { %v1767_v57 = vadd.f32 %v1740_v3, %v1647_v25 }
 0x4c0   :  { %v1486_v5 = vpop.permute.xlu1 %1485 }
 0x4c1   :  { %v1626_v58 = vpop.permute.xlu0 %1625  ;;  %v1520_v55 = vadd.f32 %v1486_v5, %v2868_v4 }
 0x4c2   :  { %v1650_v30 = vadd.f32 %v1626_v58, %v1530_v13 }
 0x4c3   :  { %v1640_v21 = vadd.f32 %v1606_v48, %v1520_v55 }
 0x4c5   :  { %v1760_v43 = vadd.f32 %v1726_v47, %v1640_v21 }
 0x4c8   :  { %v1484_v17 = vpop.permute.xlu1 %1483 }
 0x4c9   :  { %v1519_v44 = vadd.f32 %v1484_v17, %v2855_v49 }
 0x4ca   :  { %v1746_v32 = vpop.permute.xlu0 %1745 }
 0x4cb   :  { %v1770_v46 = vadd.f32 %v1746_v32, %v1650_v30 }
 0x4cd   :  { %1780 = vmatpush.msrb.mxu0 %v1770_v46 }
 0x4cf   :  { %1781 = vmatpush.msrb.mxu0 %v1769_v24 }
 0x4d0   :  { %v1604_v53 = vpop.permute.xlu1 %1603 }
 0x4d1   :  { %1782 = vmatpush.msrb.mxu0 %v1768_v26  ;;  %v1639_v35 = vadd.f32 %v1604_v53, %v1519_v44 }
 0x4d2   :  { %v1730_v50 = vpop.permute.xlu0 %1729 }
 0x4d3   :  { %1783 = vmatpush.msrb.mxu0 %v1767_v57  ;;  %v1762_v22 = vadd.f32 %v1730_v50, %v2982_v29 }
 0x4d5   :  { %1784 = vmatpush.msrb.mxu0 %v1766_v1 }
 0x4d7   :  { %1785 = vmatpush.msrb.mxu0 %v1765_v16 }
 0x4d9   :  { %1786 = vmatpush.msrb.mxu0 %v1764_v38 }
 0x4da   :  { %v1728_v18 = vpop.permute.xlu0 %1727 }
 0x4db   :  { %1787 = vmatpush.msrb.mxu0 %v1763_v62  ;;  %v1761_v33 = vadd.f32 %v1728_v18, %v1641_v20 }
 0x4dd   :  { %1788 = vmatpush.msrb.mxu0 %v1762_v22 }
 0x4df   :  { %1789 = vmatpush.msrb.mxu0 %v1761_v33 }
 0x4e1   :  { %1790 = vmatpush.msrb.mxu0 %v1760_v43 }
 0x4e2   :  { %v1724_v4 = vpop.permute.xlu0 %1723 }
 0x4e3   :  { %v1759_v54 = vadd.f32 %v1724_v4, %v1639_v35 }
 0x4e5   :  { %1791 = vmatpush.msrb.mxu0 %v1759_v54 }
 0x4e6   :  { %1975 = vmatmul.msk.f32.vlgmr.msrb.gmra.mxu0 %vm1071_vm12, %v1771_v52 }
 0x563   :  { %v1793_v23 = vpop.f32.mrf.mxu0 }
 0x564   :  { %v1794_v29 = vadd.f32 %v1793_v23, %v1772_v36 }
 0x566   :  { %v1797_v62 = vsel %vm1796_vm10, %v1794_v29, -inf }
 0x567   :  { %1798 = vmax.xlane.f32.xlu1 %v1797_v62 }
 0x5da   :  { %v1799_v56 = vpop.xlane.xlu1 %1798 }
 0x5db   :  { %v1800_v61 = vsub.f32 %v1794_v29, %v1799_v56 }
 0x5dd   :  { %v1801_v59 = vmul.f32 1.442695, %v1800_v61 }
 0x5df   :  { %2150 = vpow2.f32 %v1801_v59 }
 0x5e5   :  { %v2151_v49 = vpop.eup %2150 }
 0x5e6   :  { %v1803_v38 = vsel %vm1796_vm10, %v2151_v49, 0.0 }
 0x5e7   :  { %1804 = vadd.xlane.f32.xlu2 %v1803_v38 }
 0x65a   :  { %v1805_v7 = vpop.xlane.xlu2 %1804 }
 0x65b   :  { %2152 = vrcp.f32 %v1805_v7 }
 0x661   :  { %v2153_v39 = vpop.eup %2152 }
 0x662   :  { %v1807_v41 = vmul.f32 %v2153_v39, %v2151_v49 }
 0x664   :  { %1808 = vst.msk [vmem:[%s3007_s5] sm:$0xf] %vm1796_vm10, %v1807_v41 }
 0x665   :  { %1813 = vsyncpa [#allocation3], 1 }
 0x666   :  { %1814 = vsyncpa [#allocation5], 1 }

</bundles_post_ra>
